<compile_context>
chip_gen: v6e
topology: v6e:2x2x1
jax: 0.10.0
libtpu: 0.0.40
codegen_flags: <defaults>
</compile_context>

<pallas_src>
import functools

import jax
import jax.numpy as jnp
import numpy as np
from jax import lax
from jax.experimental import pallas as pl
from jax.experimental.pallas import tpu as pltpu


def _resblock_kernel(x_ref, mask_ref, w1_ref, w2_ref, o_ref, *, W, k, NHW):
    """Whole batch in one step, lane-dense (C, N*H*W) layout.

    x_ref    : (C, N*H*W)       input, batch folded into the lane axis
    mask_ref : (k*k, 1, N*H*W)  0/1 SAME-padding masks, tap t = kh*k + kw
    w1_ref   : (k*k, C, C)      conv1 weights, w1_ref[t][o, i] = W1[o, i, kh, kw]
    w2_ref   : (k*k, C, C)      conv2 weights
    o_ref    : (C, N*H*W)       output
    """
    p = k // 2
    x = x_ref[...].astype(jnp.float32)                        # (C, NHW)

    # Static lane shift per tap (jnp.roll-style).  Valid taps never leave their
    # image's lane chunk; wrapped / cross-image lanes are zeroed by the masks.
    shifts = [(-((kh - p) * W + (kw - p))) % NHW
              for kh in range(k) for kw in range(k)]

    def conv(inp, w_ref):
        # k*k accumulating matmuls -- no (k*k*C, NHW) im2col materialization,
        # no sublane-misaligned concatenate.
        acc = jnp.zeros(inp.shape, jnp.float32)
        for t, shift in enumerate(shifts):
            rolled = pltpu.roll(inp, shift, axis=1) if shift else inp
            masked = rolled * mask_ref[t]                     # (C,NHW)*(1,NHW)
            # TODO(synk): cast masked / w_ref[t] to bf16 for wf>=32 on v6e/v7x
            # (native bf16 MXU); at wf=4 the casts cost more than they save.
            acc = acc + jnp.dot(w_ref[t], masked,
                                preferred_element_type=jnp.float32)
        return acc

    h1 = jnp.maximum(conv(x, w1_ref), 0.0)                    # conv1 + ReLU
    y = conv(h1, w2_ref)                                      # conv2
    o_ref[...] = (y + x).astype(o_ref.dtype)                  # residual add


def _same_pad_masks(N, H, W, k):
    """(k*k, 1, N*H*W) float32 0/1 masks for SAME zero padding, tap t = kh*k+kw."""
    p = k // 2
    h = np.arange(H)[:, None]
    w = np.arange(W)[None, :]
    masks = []
    for kh in range(k):
        for kw in range(k):
            dh, dw = kh - p, kw - p
            valid = ((h + dh >= 0) & (h + dh < H) &
                     (w + dw >= 0) & (w + dw < W))
            masks.append(np.tile(valid.reshape(-1), N))       # per-image mask
    return np.stack(masks).astype(np.float32).reshape(k * k, 1, N * H * W)


def res_block(x_nchw, w1_oihw, w2_oihw):
    """ResBlock forward. x_nchw: (N, C, H, W); weights: (out, in, kh, kw)."""
    N, C, H, W = x_nchw.shape
    k = w1_oihw.shape[-1]
    assert k % 2 == 1, "odd kernel size expected (padding=k//2 preserves H, W)"
    NHW = N * H * W

    # Lane-dense slab: (N, C, H, W) -> (C, N*H*W).  Pure layout plumbing.
    x_flat = jnp.transpose(x_nchw, (1, 0, 2, 3)).reshape(C, NHW)
    # (out, in, kh, kw) -> (kh*k + kw, out, in): one (C, C) matrix per tap.
    w1 = jnp.transpose(w1_oihw, (2, 3, 0, 1)).reshape(k * k, C, C)
    w2 = jnp.transpose(w2_oihw, (2, 3, 0, 1)).reshape(k * k, C, C)
    mask = jnp.asarray(_same_pad_masks(N, H, W, k))

    kern = functools.partial(_resblock_kernel, W=W, k=k, NHW=NHW)

    # TODO(synk): for real deblur resolutions (large H*W, wf>=32) switch to
    # halo'd row-band tiling (>=2 bands marked "parallel" so both v7x
    # TensorCores get work; vertical taps become static sublane slices),
    # single-buffer the grid-invariant weights/masks, and set vmem_limit_bytes
    # re-derived for v7x's 64 MiB VMEM; the full-batch slab here is only a few KB.
    out_flat = pl.pallas_call(
        kern,
        out_shape=jax.ShapeDtypeStruct((C, NHW), x_nchw.dtype),
        grid_spec=pltpu.PrefetchScalarGridSpec(
            num_scalar_prefetch=0,
            grid=(1,),
            in_specs=[
                pl.BlockSpec((C, NHW), lambda i: (0, 0)),
                pl.BlockSpec((k * k, 1, NHW), lambda i: (0, 0, 0)),
                pl.BlockSpec((k * k, C, C), lambda i: (0, 0, 0)),
                pl.BlockSpec((k * k, C, C), lambda i: (0, 0, 0)),
            ],
            out_specs=pl.BlockSpec((C, NHW), lambda i: (0, 0)),
        ),
        compiler_params=pltpu.CompilerParams(
            dimension_semantics=("arbitrary",)),
    )(x_flat, mask, w1, w2)

    return jnp.transpose(out_flat.reshape(C, N, H, W), (1, 0, 2, 3))


def _ref_resblock(x_nchw, w1, w2):
    """Pure-JAX reference matching PyTorch semantics (explicit p=k//2 padding)."""
    k = w1.shape[-1]
    p = k // 2
    dn = ('NCHW', 'OIHW', 'NCHW')
    y = lax.conv_general_dilated(x_nchw, w1, (1, 1), [(p, p), (p, p)],
                                 dimension_numbers=dn)
    y = jnp.maximum(y, 0.0)
    y = lax.conv_general_dilated(y, w2, (1, 1), [(p, p), (p, p)],
                                 dimension_numbers=dn)
    return y + x_nchw


if __name__ == "__main__":
    # Module-consistent small config: wf=4, kernel_size=3, bias=False, act=ReLU.
    wf, ksize = 4, 3
    N, H, W = 2, 16, 16

    key = jax.random.PRNGKey(0)
    kx, k1, k2 = jax.random.split(key, 3)
    x = jax.random.normal(kx, (N, wf, H, W), jnp.float32)
    fan_in = wf * ksize * ksize
    w1 = jax.random.normal(k1, (wf, wf, ksize, ksize), jnp.float32) / np.sqrt(fan_in)
    w2 = jax.random.normal(k2, (wf, wf, ksize, ksize), jnp.float32) / np.sqrt(fan_in)
    # bias=False (module default); a biased variant would just add a (C, 1) vector.

    out = jax.block_until_ready(res_block(x, w1, w2))
    ref = jax.block_until_ready(_ref_resblock(x, w1, w2))
    assert out.shape == x.shape and out.dtype == x.dtype
    np.testing.assert_allclose(np.asarray(out), np.asarray(ref), rtol=1e-4, atol=1e-4)
    print("KERNEL_OK")
</pallas_src>

<mosaic_0001>
module attributes {stable_mosaic.version = 11 : i64} {
  func.func @_resblock_kernel(%arg0: i32, %arg1: memref<4x512xf32, #tpu.memory_space<vmem>>, %arg2: memref<9x1x512xf32, #tpu.memory_space<vmem>>, %arg3: memref<9x4x4xf32, #tpu.memory_space<vmem>>, %arg4: memref<9x4x4xf32, #tpu.memory_space<vmem>>, %arg5: memref<4x512xf32, #tpu.memory_space<vmem>>) attributes {dimension_semantics = [#tpu.dimension_semantics<arbitrary>], iteration_bounds = array<i64: 1>, scalar_prefetch = 0 : i64, scratch_operands = 0 : i64, tpu.core_type = #tpu.core_type<tc>, window_params = [{pipeline_mode = #tpu.pipeline_mode<synchronous>, transform_indices = @transform_0, window_bounds = array<i64: 4, 512>}, {pipeline_mode = #tpu.pipeline_mode<synchronous>, transform_indices = @transform_1, window_bounds = array<i64: 9, 1, 512>}, {pipeline_mode = #tpu.pipeline_mode<synchronous>, transform_indices = @transform_2, window_bounds = array<i64: 9, 4, 4>}, {pipeline_mode = #tpu.pipeline_mode<synchronous>, transform_indices = @transform_3, window_bounds = array<i64: 9, 4, 4>}, {pipeline_mode = #tpu.pipeline_mode<synchronous>, transform_indices = @transform_4, window_bounds = array<i64: 4, 512>}]} {
    %c0 = arith.constant 0 : index
    %c0_0 = arith.constant 0 : index
    %0 = vector.load %arg1[%c0, %c0_0] : memref<4x512xf32, #tpu.memory_space<vmem>>, vector<4x512xf32>
    %cst = arith.constant 0.000000e+00 : f32
    %1 = vector.broadcast %cst : f32 to vector<4x512xf32>
    %c17_i32 = arith.constant 17 : i32
    %2 = tpu.dynamic_rotate %0 by %c17_i32 dim 1 : vector<4x512xf32>, i32 -> vector<4x512xf32>
    %c0_1 = arith.constant 0 : index
    %c0_2 = arith.constant 0 : index
    %c0_3 = arith.constant 0 : index
    %3 = vector.load %arg2[%c0_1, %c0_2, %c0_3] : memref<9x1x512xf32, #tpu.memory_space<vmem>>, vector<1x1x512xf32>
    %4 = vector.shape_cast %3 : vector<1x1x512xf32> to vector<1x512xf32>
    %5 = vector.broadcast %4 : vector<1x512xf32> to vector<4x512xf32>
    %6 = arith.mulf %2, %5 : vector<4x512xf32>
    %c0_4 = arith.constant 0 : index
    %c0_5 = arith.constant 0 : index
    %c0_6 = arith.constant 0 : index
    %7 = vector.load %arg3[%c0_4, %c0_5, %c0_6] : memref<9x4x4xf32, #tpu.memory_space<vmem>>, vector<1x4x4xf32>
    %8 = vector.shape_cast %7 : vector<1x4x4xf32> to vector<4x4xf32>
    %cst_7 = arith.constant dense<0.000000e+00> : vector<4x512xf32>
    %9 = tpu.matmul %8, %6, %cst_7 {dimension_numbers = #tpu.dot_dimension_numbers<[1], [0], [0], [1], [0, 0, 1, 1], [], []>} : vector<4x4xf32>, vector<4x512xf32>, vector<4x512xf32> -> vector<4x512xf32>
    %10 = arith.addf %1, %9 : vector<4x512xf32>
    %c16_i32 = arith.constant 16 : i32
    %11 = tpu.dynamic_rotate %0 by %c16_i32 dim 1 : vector<4x512xf32>, i32 -> vector<4x512xf32>
    %c1 = arith.constant 1 : index
    %c0_8 = arith.constant 0 : index
    %c0_9 = arith.constant 0 : index
    %12 = vector.load %arg2[%c1, %c0_8, %c0_9] : memref<9x1x512xf32, #tpu.memory_space<vmem>>, vector<1x1x512xf32>
    %13 = vector.shape_cast %12 : vector<1x1x512xf32> to vector<1x512xf32>
    %14 = vector.broadcast %13 : vector<1x512xf32> to vector<4x512xf32>
    %15 = arith.mulf %11, %14 : vector<4x512xf32>
    %c1_10 = arith.constant 1 : index
    %c0_11 = arith.constant 0 : index
    %c0_12 = arith.constant 0 : index
    %16 = vector.load %arg3[%c1_10, %c0_11, %c0_12] : memref<9x4x4xf32, #tpu.memory_space<vmem>>, vector<1x4x4xf32>
    %17 = vector.shape_cast %16 : vector<1x4x4xf32> to vector<4x4xf32>
    %cst_13 = arith.constant dense<0.000000e+00> : vector<4x512xf32>
    %18 = tpu.matmul %17, %15, %cst_13 {dimension_numbers = #tpu.dot_dimension_numbers<[1], [0], [0], [1], [0, 0, 1, 1], [], []>} : vector<4x4xf32>, vector<4x512xf32>, vector<4x512xf32> -> vector<4x512xf32>
    %19 = arith.addf %10, %18 : vector<4x512xf32>
    %c15_i32 = arith.constant 15 : i32
    %20 = tpu.dynamic_rotate %0 by %c15_i32 dim 1 : vector<4x512xf32>, i32 -> vector<4x512xf32>
    %c2 = arith.constant 2 : index
    %c0_14 = arith.constant 0 : index
    %c0_15 = arith.constant 0 : index
    %21 = vector.load %arg2[%c2, %c0_14, %c0_15] : memref<9x1x512xf32, #tpu.memory_space<vmem>>, vector<1x1x512xf32>
    %22 = vector.shape_cast %21 : vector<1x1x512xf32> to vector<1x512xf32>
    %23 = vector.broadcast %22 : vector<1x512xf32> to vector<4x512xf32>
    %24 = arith.mulf %20, %23 : vector<4x512xf32>
    %c2_16 = arith.constant 2 : index
    %c0_17 = arith.constant 0 : index
    %c0_18 = arith.constant 0 : index
    %25 = vector.load %arg3[%c2_16, %c0_17, %c0_18] : memref<9x4x4xf32, #tpu.memory_space<vmem>>, vector<1x4x4xf32>
    %26 = vector.shape_cast %25 : vector<1x4x4xf32> to vector<4x4xf32>
    %cst_19 = arith.constant dense<0.000000e+00> : vector<4x512xf32>
    %27 = tpu.matmul %26, %24, %cst_19 {dimension_numbers = #tpu.dot_dimension_numbers<[1], [0], [0], [1], [0, 0, 1, 1], [], []>} : vector<4x4xf32>, vector<4x512xf32>, vector<4x512xf32> -> vector<4x512xf32>
    %28 = arith.addf %19, %27 : vector<4x512xf32>
    %c1_i32 = arith.constant 1 : i32
    %29 = tpu.dynamic_rotate %0 by %c1_i32 dim 1 : vector<4x512xf32>, i32 -> vector<4x512xf32>
    %c3 = arith.constant 3 : index
    %c0_20 = arith.constant 0 : index
    %c0_21 = arith.constant 0 : index
    %30 = vector.load %arg2[%c3, %c0_20, %c0_21] : memref<9x1x512xf32, #tpu.memory_space<vmem>>, vector<1x1x512xf32>
    %31 = vector.shape_cast %30 : vector<1x1x512xf32> to vector<1x512xf32>
    %32 = vector.broadcast %31 : vector<1x512xf32> to vector<4x512xf32>
    %33 = arith.mulf %29, %32 : vector<4x512xf32>
    %c3_22 = arith.constant 3 : index
    %c0_23 = arith.constant 0 : index
    %c0_24 = arith.constant 0 : index
    %34 = vector.load %arg3[%c3_22, %c0_23, %c0_24] : memref<9x4x4xf32, #tpu.memory_space<vmem>>, vector<1x4x4xf32>
    %35 = vector.shape_cast %34 : vector<1x4x4xf32> to vector<4x4xf32>
    %cst_25 = arith.constant dense<0.000000e+00> : vector<4x512xf32>
    %36 = tpu.matmul %35, %33, %cst_25 {dimension_numbers = #tpu.dot_dimension_numbers<[1], [0], [0], [1], [0, 0, 1, 1], [], []>} : vector<4x4xf32>, vector<4x512xf32>, vector<4x512xf32> -> vector<4x512xf32>
    %37 = arith.addf %28, %36 : vector<4x512xf32>
    %c4 = arith.constant 4 : index
    %c0_26 = arith.constant 0 : index
    %c0_27 = arith.constant 0 : index
    %38 = vector.load %arg2[%c4, %c0_26, %c0_27] : memref<9x1x512xf32, #tpu.memory_space<vmem>>, vector<1x1x512xf32>
    %39 = vector.shape_cast %38 : vector<1x1x512xf32> to vector<1x512xf32>
    %40 = vector.broadcast %39 : vector<1x512xf32> to vector<4x512xf32>
    %41 = arith.mulf %0, %40 : vector<4x512xf32>
    %c4_28 = arith.constant 4 : index
    %c0_29 = arith.constant 0 : index
    %c0_30 = arith.constant 0 : index
    %42 = vector.load %arg3[%c4_28, %c0_29, %c0_30] : memref<9x4x4xf32, #tpu.memory_space<vmem>>, vector<1x4x4xf32>
    %43 = vector.shape_cast %42 : vector<1x4x4xf32> to vector<4x4xf32>
    %cst_31 = arith.constant dense<0.000000e+00> : vector<4x512xf32>
    %44 = tpu.matmul %43, %41, %cst_31 {dimension_numbers = #tpu.dot_dimension_numbers<[1], [0], [0], [1], [0, 0, 1, 1], [], []>} : vector<4x4xf32>, vector<4x512xf32>, vector<4x512xf32> -> vector<4x512xf32>
    %45 = arith.addf %37, %44 : vector<4x512xf32>
    %c511_i32 = arith.constant 511 : i32
    %46 = tpu.dynamic_rotate %0 by %c511_i32 dim 1 : vector<4x512xf32>, i32 -> vector<4x512xf32>
    %c5 = arith.constant 5 : index
    %c0_32 = arith.constant 0 : index
    %c0_33 = arith.constant 0 : index
    %47 = vector.load %arg2[%c5, %c0_32, %c0_33] : memref<9x1x512xf32, #tpu.memory_space<vmem>>, vector<1x1x512xf32>
    %48 = vector.shape_cast %47 : vector<1x1x512xf32> to vector<1x512xf32>
    %49 = vector.broadcast %48 : vector<1x512xf32> to vector<4x512xf32>
    %50 = arith.mulf %46, %49 : vector<4x512xf32>
    %c5_34 = arith.constant 5 : index
    %c0_35 = arith.constant 0 : index
    %c0_36 = arith.constant 0 : index
    %51 = vector.load %arg3[%c5_34, %c0_35, %c0_36] : memref<9x4x4xf32, #tpu.memory_space<vmem>>, vector<1x4x4xf32>
    %52 = vector.shape_cast %51 : vector<1x4x4xf32> to vector<4x4xf32>
    %cst_37 = arith.constant dense<0.000000e+00> : vector<4x512xf32>
    %53 = tpu.matmul %52, %50, %cst_37 {dimension_numbers = #tpu.dot_dimension_numbers<[1], [0], [0], [1], [0, 0, 1, 1], [], []>} : vector<4x4xf32>, vector<4x512xf32>, vector<4x512xf32> -> vector<4x512xf32>
    %54 = arith.addf %45, %53 : vector<4x512xf32>
    %c497_i32 = arith.constant 497 : i32
    %55 = tpu.dynamic_rotate %0 by %c497_i32 dim 1 : vector<4x512xf32>, i32 -> vector<4x512xf32>
    %c6 = arith.constant 6 : index
    %c0_38 = arith.constant 0 : index
    %c0_39 = arith.constant 0 : index
    %56 = vector.load %arg2[%c6, %c0_38, %c0_39] : memref<9x1x512xf32, #tpu.memory_space<vmem>>, vector<1x1x512xf32>
    %57 = vector.shape_cast %56 : vector<1x1x512xf32> to vector<1x512xf32>
    %58 = vector.broadcast %57 : vector<1x512xf32> to vector<4x512xf32>
    %59 = arith.mulf %55, %58 : vector<4x512xf32>
    %c6_40 = arith.constant 6 : index
    %c0_41 = arith.constant 0 : index
    %c0_42 = arith.constant 0 : index
    %60 = vector.load %arg3[%c6_40, %c0_41, %c0_42] : memref<9x4x4xf32, #tpu.memory_space<vmem>>, vector<1x4x4xf32>
    %61 = vector.shape_cast %60 : vector<1x4x4xf32> to vector<4x4xf32>
    %cst_43 = arith.constant dense<0.000000e+00> : vector<4x512xf32>
    %62 = tpu.matmul %61, %59, %cst_43 {dimension_numbers = #tpu.dot_dimension_numbers<[1], [0], [0], [1], [0, 0, 1, 1], [], []>} : vector<4x4xf32>, vector<4x512xf32>, vector<4x512xf32> -> vector<4x512xf32>
    %63 = arith.addf %54, %62 : vector<4x512xf32>
    %c496_i32 = arith.constant 496 : i32
    %64 = tpu.dynamic_rotate %0 by %c496_i32 dim 1 : vector<4x512xf32>, i32 -> vector<4x512xf32>
    %c7 = arith.constant 7 : index
    %c0_44 = arith.constant 0 : index
    %c0_45 = arith.constant 0 : index
    %65 = vector.load %arg2[%c7, %c0_44, %c0_45] : memref<9x1x512xf32, #tpu.memory_space<vmem>>, vector<1x1x512xf32>
    %66 = vector.shape_cast %65 : vector<1x1x512xf32> to vector<1x512xf32>
    %67 = vector.broadcast %66 : vector<1x512xf32> to vector<4x512xf32>
    %68 = arith.mulf %64, %67 : vector<4x512xf32>
    %c7_46 = arith.constant 7 : index
    %c0_47 = arith.constant 0 : index
    %c0_48 = arith.constant 0 : index
    %69 = vector.load %arg3[%c7_46, %c0_47, %c0_48] : memref<9x4x4xf32, #tpu.memory_space<vmem>>, vector<1x4x4xf32>
    %70 = vector.shape_cast %69 : vector<1x4x4xf32> to vector<4x4xf32>
    %cst_49 = arith.constant dense<0.000000e+00> : vector<4x512xf32>
    %71 = tpu.matmul %70, %68, %cst_49 {dimension_numbers = #tpu.dot_dimension_numbers<[1], [0], [0], [1], [0, 0, 1, 1], [], []>} : vector<4x4xf32>, vector<4x512xf32>, vector<4x512xf32> -> vector<4x512xf32>
    %72 = arith.addf %63, %71 : vector<4x512xf32>
    %c495_i32 = arith.constant 495 : i32
    %73 = tpu.dynamic_rotate %0 by %c495_i32 dim 1 : vector<4x512xf32>, i32 -> vector<4x512xf32>
    %c8 = arith.constant 8 : index
    %c0_50 = arith.constant 0 : index
    %c0_51 = arith.constant 0 : index
    %74 = vector.load %arg2[%c8, %c0_50, %c0_51] : memref<9x1x512xf32, #tpu.memory_space<vmem>>, vector<1x1x512xf32>
    %75 = vector.shape_cast %74 : vector<1x1x512xf32> to vector<1x512xf32>
    %76 = vector.broadcast %75 : vector<1x512xf32> to vector<4x512xf32>
    %77 = arith.mulf %73, %76 : vector<4x512xf32>
    %c8_52 = arith.constant 8 : index
    %c0_53 = arith.constant 0 : index
    %c0_54 = arith.constant 0 : index
    %78 = vector.load %arg3[%c8_52, %c0_53, %c0_54] : memref<9x4x4xf32, #tpu.memory_space<vmem>>, vector<1x4x4xf32>
    %79 = vector.shape_cast %78 : vector<1x4x4xf32> to vector<4x4xf32>
    %cst_55 = arith.constant dense<0.000000e+00> : vector<4x512xf32>
    %80 = tpu.matmul %79, %77, %cst_55 {dimension_numbers = #tpu.dot_dimension_numbers<[1], [0], [0], [1], [0, 0, 1, 1], [], []>} : vector<4x4xf32>, vector<4x512xf32>, vector<4x512xf32> -> vector<4x512xf32>
    %81 = arith.addf %72, %80 : vector<4x512xf32>
    %cst_56 = arith.constant 0.000000e+00 : f32
    %82 = vector.broadcast %cst_56 : f32 to vector<4x512xf32>
    %83 = arith.maximumf %81, %82 : vector<4x512xf32>
    %cst_57 = arith.constant 0.000000e+00 : f32
    %84 = vector.broadcast %cst_57 : f32 to vector<4x512xf32>
    %c17_i32_58 = arith.constant 17 : i32
    %85 = tpu.dynamic_rotate %83 by %c17_i32_58 dim 1 : vector<4x512xf32>, i32 -> vector<4x512xf32>
    %c0_59 = arith.constant 0 : index
    %c0_60 = arith.constant 0 : index
    %c0_61 = arith.constant 0 : index
    %86 = vector.load %arg2[%c0_59, %c0_60, %c0_61] : memref<9x1x512xf32, #tpu.memory_space<vmem>>, vector<1x1x512xf32>
    %87 = vector.shape_cast %86 : vector<1x1x512xf32> to vector<1x512xf32>
    %88 = vector.broadcast %87 : vector<1x512xf32> to vector<4x512xf32>
    %89 = arith.mulf %85, %88 : vector<4x512xf32>
    %c0_62 = arith.constant 0 : index
    %c0_63 = arith.constant 0 : index
    %c0_64 = arith.constant 0 : index
    %90 = vector.load %arg4[%c0_62, %c0_63, %c0_64] : memref<9x4x4xf32, #tpu.memory_space<vmem>>, vector<1x4x4xf32>
    %91 = vector.shape_cast %90 : vector<1x4x4xf32> to vector<4x4xf32>
    %cst_65 = arith.constant dense<0.000000e+00> : vector<4x512xf32>
    %92 = tpu.matmul %91, %89, %cst_65 {dimension_numbers = #tpu.dot_dimension_numbers<[1], [0], [0], [1], [0, 0, 1, 1], [], []>} : vector<4x4xf32>, vector<4x512xf32>, vector<4x512xf32> -> vector<4x512xf32>
    %93 = arith.addf %84, %92 : vector<4x512xf32>
    %c16_i32_66 = arith.constant 16 : i32
    %94 = tpu.dynamic_rotate %83 by %c16_i32_66 dim 1 : vector<4x512xf32>, i32 -> vector<4x512xf32>
    %c1_67 = arith.constant 1 : index
    %c0_68 = arith.constant 0 : index
    %c0_69 = arith.constant 0 : index
    %95 = vector.load %arg2[%c1_67, %c0_68, %c0_69] : memref<9x1x512xf32, #tpu.memory_space<vmem>>, vector<1x1x512xf32>
    %96 = vector.shape_cast %95 : vector<1x1x512xf32> to vector<1x512xf32>
    %97 = vector.broadcast %96 : vector<1x512xf32> to vector<4x512xf32>
    %98 = arith.mulf %94, %97 : vector<4x512xf32>
    %c1_70 = arith.constant 1 : index
    %c0_71 = arith.constant 0 : index
    %c0_72 = arith.constant 0 : index
    %99 = vector.load %arg4[%c1_70, %c0_71, %c0_72] : memref<9x4x4xf32, #tpu.memory_space<vmem>>, vector<1x4x4xf32>
    %100 = vector.shape_cast %99 : vector<1x4x4xf32> to vector<4x4xf32>
    %cst_73 = arith.constant dense<0.000000e+00> : vector<4x512xf32>
    %101 = tpu.matmul %100, %98, %cst_73 {dimension_numbers = #tpu.dot_dimension_numbers<[1], [0], [0], [1], [0, 0, 1, 1], [], []>} : vector<4x4xf32>, vector<4x512xf32>, vector<4x512xf32> -> vector<4x512xf32>
    %102 = arith.addf %93, %101 : vector<4x512xf32>
    %c15_i32_74 = arith.constant 15 : i32
    %103 = tpu.dynamic_rotate %83 by %c15_i32_74 dim 1 : vector<4x512xf32>, i32 -> vector<4x512xf32>
    %c2_75 = arith.constant 2 : index
    %c0_76 = arith.constant 0 : index
    %c0_77 = arith.constant 0 : index
    %104 = vector.load %arg2[%c2_75, %c0_76, %c0_77] : memref<9x1x512xf32, #tpu.memory_space<vmem>>, vector<1x1x512xf32>
    %105 = vector.shape_cast %104 : vector<1x1x512xf32> to vector<1x512xf32>
    %106 = vector.broadcast %105 : vector<1x512xf32> to vector<4x512xf32>
    %107 = arith.mulf %103, %106 : vector<4x512xf32>
    %c2_78 = arith.constant 2 : index
    %c0_79 = arith.constant 0 : index
    %c0_80 = arith.constant 0 : index
    %108 = vector.load %arg4[%c2_78, %c0_79, %c0_80] : memref<9x4x4xf32, #tpu.memory_space<vmem>>, vector<1x4x4xf32>
    %109 = vector.shape_cast %108 : vector<1x4x4xf32> to vector<4x4xf32>
    %cst_81 = arith.constant dense<0.000000e+00> : vector<4x512xf32>
    %110 = tpu.matmul %109, %107, %cst_81 {dimension_numbers = #tpu.dot_dimension_numbers<[1], [0], [0], [1], [0, 0, 1, 1], [], []>} : vector<4x4xf32>, vector<4x512xf32>, vector<4x512xf32> -> vector<4x512xf32>
    %111 = arith.addf %102, %110 : vector<4x512xf32>
    %c1_i32_82 = arith.constant 1 : i32
    %112 = tpu.dynamic_rotate %83 by %c1_i32_82 dim 1 : vector<4x512xf32>, i32 -> vector<4x512xf32>
    %c3_83 = arith.constant 3 : index
    %c0_84 = arith.constant 0 : index
    %c0_85 = arith.constant 0 : index
    %113 = vector.load %arg2[%c3_83, %c0_84, %c0_85] : memref<9x1x512xf32, #tpu.memory_space<vmem>>, vector<1x1x512xf32>
    %114 = vector.shape_cast %113 : vector<1x1x512xf32> to vector<1x512xf32>
    %115 = vector.broadcast %114 : vector<1x512xf32> to vector<4x512xf32>
    %116 = arith.mulf %112, %115 : vector<4x512xf32>
    %c3_86 = arith.constant 3 : index
    %c0_87 = arith.constant 0 : index
    %c0_88 = arith.constant 0 : index
    %117 = vector.load %arg4[%c3_86, %c0_87, %c0_88] : memref<9x4x4xf32, #tpu.memory_space<vmem>>, vector<1x4x4xf32>
    %118 = vector.shape_cast %117 : vector<1x4x4xf32> to vector<4x4xf32>
    %cst_89 = arith.constant dense<0.000000e+00> : vector<4x512xf32>
    %119 = tpu.matmul %118, %116, %cst_89 {dimension_numbers = #tpu.dot_dimension_numbers<[1], [0], [0], [1], [0, 0, 1, 1], [], []>} : vector<4x4xf32>, vector<4x512xf32>, vector<4x512xf32> -> vector<4x512xf32>
    %120 = arith.addf %111, %119 : vector<4x512xf32>
    %c4_90 = arith.constant 4 : index
    %c0_91 = arith.constant 0 : index
    %c0_92 = arith.constant 0 : index
    %121 = vector.load %arg2[%c4_90, %c0_91, %c0_92] : memref<9x1x512xf32, #tpu.memory_space<vmem>>, vector<1x1x512xf32>
    %122 = vector.shape_cast %121 : vector<1x1x512xf32> to vector<1x512xf32>
    %123 = vector.broadcast %122 : vector<1x512xf32> to vector<4x512xf32>
    %124 = arith.mulf %83, %123 : vector<4x512xf32>
    %c4_93 = arith.constant 4 : index
    %c0_94 = arith.constant 0 : index
    %c0_95 = arith.constant 0 : index
    %125 = vector.load %arg4[%c4_93, %c0_94, %c0_95] : memref<9x4x4xf32, #tpu.memory_space<vmem>>, vector<1x4x4xf32>
    %126 = vector.shape_cast %125 : vector<1x4x4xf32> to vector<4x4xf32>
    %cst_96 = arith.constant dense<0.000000e+00> : vector<4x512xf32>
    %127 = tpu.matmul %126, %124, %cst_96 {dimension_numbers = #tpu.dot_dimension_numbers<[1], [0], [0], [1], [0, 0, 1, 1], [], []>} : vector<4x4xf32>, vector<4x512xf32>, vector<4x512xf32> -> vector<4x512xf32>
    %128 = arith.addf %120, %127 : vector<4x512xf32>
    %c511_i32_97 = arith.constant 511 : i32
    %129 = tpu.dynamic_rotate %83 by %c511_i32_97 dim 1 : vector<4x512xf32>, i32 -> vector<4x512xf32>
    %c5_98 = arith.constant 5 : index
    %c0_99 = arith.constant 0 : index
    %c0_100 = arith.constant 0 : index
    %130 = vector.load %arg2[%c5_98, %c0_99, %c0_100] : memref<9x1x512xf32, #tpu.memory_space<vmem>>, vector<1x1x512xf32>
    %131 = vector.shape_cast %130 : vector<1x1x512xf32> to vector<1x512xf32>
    %132 = vector.broadcast %131 : vector<1x512xf32> to vector<4x512xf32>
    %133 = arith.mulf %129, %132 : vector<4x512xf32>
    %c5_101 = arith.constant 5 : index
    %c0_102 = arith.constant 0 : index
    %c0_103 = arith.constant 0 : index
    %134 = vector.load %arg4[%c5_101, %c0_102, %c0_103] : memref<9x4x4xf32, #tpu.memory_space<vmem>>, vector<1x4x4xf32>
    %135 = vector.shape_cast %134 : vector<1x4x4xf32> to vector<4x4xf32>
    %cst_104 = arith.constant dense<0.000000e+00> : vector<4x512xf32>
    %136 = tpu.matmul %135, %133, %cst_104 {dimension_numbers = #tpu.dot_dimension_numbers<[1], [0], [0], [1], [0, 0, 1, 1], [], []>} : vector<4x4xf32>, vector<4x512xf32>, vector<4x512xf32> -> vector<4x512xf32>
    %137 = arith.addf %128, %136 : vector<4x512xf32>
    %c497_i32_105 = arith.constant 497 : i32
    %138 = tpu.dynamic_rotate %83 by %c497_i32_105 dim 1 : vector<4x512xf32>, i32 -> vector<4x512xf32>
    %c6_106 = arith.constant 6 : index
    %c0_107 = arith.constant 0 : index
    %c0_108 = arith.constant 0 : index
    %139 = vector.load %arg2[%c6_106, %c0_107, %c0_108] : memref<9x1x512xf32, #tpu.memory_space<vmem>>, vector<1x1x512xf32>
    %140 = vector.shape_cast %139 : vector<1x1x512xf32> to vector<1x512xf32>
    %141 = vector.broadcast %140 : vector<1x512xf32> to vector<4x512xf32>
    %142 = arith.mulf %138, %141 : vector<4x512xf32>
    %c6_109 = arith.constant 6 : index
    %c0_110 = arith.constant 0 : index
    %c0_111 = arith.constant 0 : index
    %143 = vector.load %arg4[%c6_109, %c0_110, %c0_111] : memref<9x4x4xf32, #tpu.memory_space<vmem>>, vector<1x4x4xf32>
    %144 = vector.shape_cast %143 : vector<1x4x4xf32> to vector<4x4xf32>
    %cst_112 = arith.constant dense<0.000000e+00> : vector<4x512xf32>
    %145 = tpu.matmul %144, %142, %cst_112 {dimension_numbers = #tpu.dot_dimension_numbers<[1], [0], [0], [1], [0, 0, 1, 1], [], []>} : vector<4x4xf32>, vector<4x512xf32>, vector<4x512xf32> -> vector<4x512xf32>
    %146 = arith.addf %137, %145 : vector<4x512xf32>
    %c496_i32_113 = arith.constant 496 : i32
    %147 = tpu.dynamic_rotate %83 by %c496_i32_113 dim 1 : vector<4x512xf32>, i32 -> vector<4x512xf32>
    %c7_114 = arith.constant 7 : index
    %c0_115 = arith.constant 0 : index
    %c0_116 = arith.constant 0 : index
    %148 = vector.load %arg2[%c7_114, %c0_115, %c0_116] : memref<9x1x512xf32, #tpu.memory_space<vmem>>, vector<1x1x512xf32>
    %149 = vector.shape_cast %148 : vector<1x1x512xf32> to vector<1x512xf32>
    %150 = vector.broadcast %149 : vector<1x512xf32> to vector<4x512xf32>
    %151 = arith.mulf %147, %150 : vector<4x512xf32>
    %c7_117 = arith.constant 7 : index
    %c0_118 = arith.constant 0 : index
    %c0_119 = arith.constant 0 : index
    %152 = vector.load %arg4[%c7_117, %c0_118, %c0_119] : memref<9x4x4xf32, #tpu.memory_space<vmem>>, vector<1x4x4xf32>
    %153 = vector.shape_cast %152 : vector<1x4x4xf32> to vector<4x4xf32>
    %cst_120 = arith.constant dense<0.000000e+00> : vector<4x512xf32>
    %154 = tpu.matmul %153, %151, %cst_120 {dimension_numbers = #tpu.dot_dimension_numbers<[1], [0], [0], [1], [0, 0, 1, 1], [], []>} : vector<4x4xf32>, vector<4x512xf32>, vector<4x512xf32> -> vector<4x512xf32>
    %155 = arith.addf %146, %154 : vector<4x512xf32>
    %c495_i32_121 = arith.constant 495 : i32
    %156 = tpu.dynamic_rotate %83 by %c495_i32_121 dim 1 : vector<4x512xf32>, i32 -> vector<4x512xf32>
    %c8_122 = arith.constant 8 : index
    %c0_123 = arith.constant 0 : index
    %c0_124 = arith.constant 0 : index
    %157 = vector.load %arg2[%c8_122, %c0_123, %c0_124] : memref<9x1x512xf32, #tpu.memory_space<vmem>>, vector<1x1x512xf32>
    %158 = vector.shape_cast %157 : vector<1x1x512xf32> to vector<1x512xf32>
    %159 = vector.broadcast %158 : vector<1x512xf32> to vector<4x512xf32>
    %160 = arith.mulf %156, %159 : vector<4x512xf32>
    %c8_125 = arith.constant 8 : index
    %c0_126 = arith.constant 0 : index
    %c0_127 = arith.constant 0 : index
    %161 = vector.load %arg4[%c8_125, %c0_126, %c0_127] : memref<9x4x4xf32, #tpu.memory_space<vmem>>, vector<1x4x4xf32>
    %162 = vector.shape_cast %161 : vector<1x4x4xf32> to vector<4x4xf32>
    %cst_128 = arith.constant dense<0.000000e+00> : vector<4x512xf32>
    %163 = tpu.matmul %162, %160, %cst_128 {dimension_numbers = #tpu.dot_dimension_numbers<[1], [0], [0], [1], [0, 0, 1, 1], [], []>} : vector<4x4xf32>, vector<4x512xf32>, vector<4x512xf32> -> vector<4x512xf32>
    %164 = arith.addf %155, %163 : vector<4x512xf32>
    %165 = arith.addf %164, %0 : vector<4x512xf32>
    %c0_129 = arith.constant 0 : index
    %c0_130 = arith.constant 0 : index
    %166 = vector.load %arg5[%c0_129, %c0_130] : memref<4x512xf32, #tpu.memory_space<vmem>>, vector<4x512xf32>
    tpu.vector_store %arg5[%c0_129, %c0_130], %165 {strides = array<i32>} : memref<4x512xf32, #tpu.memory_space<vmem>>, vector<4x512xf32>,
    return
  }
  func.func @transform_0(%arg0: i32) -> (i32, i32) {
    %c0_i32 = arith.constant 0 : i32
    %c0_i32_0 = arith.constant 0 : i32
    %c0_i32_1 = arith.constant 0 : i32
    return %c0_i32, %c0_i32_0 : i32, i32
  }
  func.func @transform_1(%arg0: i32) -> (i32, i32, i32) {
    %c0_i32 = arith.constant 0 : i32
    %c0_i32_0 = arith.constant 0 : i32
    %c0_i32_1 = arith.constant 0 : i32
    %c0_i32_2 = arith.constant 0 : i32
    return %c0_i32, %c0_i32_0, %c0_i32_1 : i32, i32, i32
  }
  func.func @transform_2(%arg0: i32) -> (i32, i32, i32) {
    %c0_i32 = arith.constant 0 : i32
    %c0_i32_0 = arith.constant 0 : i32
    %c0_i32_1 = arith.constant 0 : i32
    %c0_i32_2 = arith.constant 0 : i32
    return %c0_i32, %c0_i32_0, %c0_i32_1 : i32, i32, i32
  }
  func.func @transform_3(%arg0: i32) -> (i32, i32, i32) {
    %c0_i32 = arith.constant 0 : i32
    %c0_i32_0 = arith.constant 0 : i32
    %c0_i32_1 = arith.constant 0 : i32
    %c0_i32_2 = arith.constant 0 : i32
    return %c0_i32, %c0_i32_0, %c0_i32_1 : i32, i32, i32
  }
  func.func @transform_4(%arg0: i32) -> (i32, i32) {
    %c0_i32 = arith.constant 0 : i32
    %c0_i32_0 = arith.constant 0 : i32
    %c0_i32_1 = arith.constant 0 : i32
    return %c0_i32, %c0_i32_0 : i32, i32
  }
}

</mosaic_0001>

<bundles_post_ra>
// kernel: tpu_custom_call.1
= control target key start
LH: loop header
LB: loop body
LE: loop exit
PB: predicated region body
PF: predicated region fallthrough
CT: control target
= control target key end

     0   :  { %s3626_s19 = smov 16   ;;  %v4388_v4 = vmov 0.0   ;;  %s4383_s0 = inlined_call_operand.vmem [shape: f32[4,512], index: 0, kind: input, shape index: {}]   ;;  %s4384_s1 = inlined_call_operand.vmem [shape: f32[9,1,512], index: 1, kind: input, shape index: {}]   ;;  %s4385_s2 = inlined_call_operand.vmem [shape: f32[9,4,4], index: 2, kind: input, shape index: {}]   ;;  %s4386_s3 = inlined_call_operand.vmem [shape: f32[9,4,4], index: 3, kind: input, shape index: {}]   ;;  %s4387_s4 = inlined_call_operand.hbm [shape: f32[4,512], index: 4, kind: output, shape index: {}]  }
   0x1   :  { %v3664_v0 = vld [vmem:[%s4383_s0 + $0x8] sm:$0xff]  ;;  %v3669_v1 = vld [vmem:[%s4383_s0] sm:$0xff]  ;;  %191 = vmatprep.mubr.f32.mxu0 %v4388_v4  ;;  %262 = vmatprep.mubr.f32.mxu1 %v4388_v4 }
   0x2   :  { %72 = vrot.lane.b32.xlu1 %v3664_v0, %s3626_s19  ;;  %68 = vrot.lane.b32.xlu0 %v3669_v1, %s3626_s19  ;;  %v3677_v2 = vcombine.high %v3664_v0, %v3664_v0  ;;  %v3681_v3 = vcombine.high %v3669_v1, %v3669_v1 }
   0x4   :  { %4405 = vst [vmem:[#allocation5_spill] sm:$0xff] %v3677_v2  ;;  %4406 = vst [vmem:[#allocation6_spill] sm:$0xff] %v3681_v3 }
   0x5   :  { %9 = vsyncpa [#allocation3], 0  ;;  %s3628_s20 = smov 17   ;;  %s3629_s21 = smov 15   ;;  %v34_v5 = vlaneseq  ;;  %v3458_v12 = vld [vmem:[%s4384_s1 + $0x4] sm:$0xf] }
   0x6   :  { %74 = vrot.lane.b32.xlu1 %v3677_v2, %s3626_s19  ;;  %70 = vrot.lane.b32.xlu0 %v3681_v3, %s3626_s19  ;;  %s3630_s22 = smov 1   ;;  %s3631_s23 = smov 127   ;;  %v41_v15 = vld [vmem:[%s4384_s1] sm:$0xf]  ;;  %vm114_vm1 = vcmask 1043456   ;;  %vm110_vm3 = vcmask 31744  }
   0x7   :  { %s3632_s24 = smov 113   ;;  %s3633_s25 = smov 112   ;;  %v44_v6 = vshrl.u32 %v34_v5, 7  ;;  %v3745_v7 = vand.u32 127, %v34_v5  ;;  %v3459_v31 = vld [vmem:[%s4385_s2 + $0x4] sm:$0xf] }
   0x8   :  { %s3634_s26 = smov 111   ;;  %v3472_v39 = vld [vmem:[%s4384_s1 + $0x8] sm:$0xf]  ;;  %v67_v49 = vld [vmem:[%s4385_s2] sm:$0xf]  ;;  %s3635_s10 = smov [#allocation2]  }
   0x9   :  { %v3747_v8 = vsub.s32 0, %v44_v6  ;;  %v3749_v9 = vsub.s32 2, %v44_v6  ;;  %v3751_v10 = vsub.s32 3, %v44_v6  ;;  %v3753_v11 = vsub.s32 1, %v44_v6  ;;  %v3488_v50 = vld [vmem:[%s4384_s1 + $0x10] sm:$0xf] }
   0xa   :  { %28 = vrot.lane.b32.xlu1 %v3681_v3, %s3628_s20  ;;  %26 = vrot.lane.b32.xlu0 %v3669_v1, %s3628_s20  ;;  %vm76_vm0 = vcmp.lt.s32.totalorder %v3745_v7, 16  ;;  %vm36_vm2 = vcmp.lt.s32.totalorder %v3745_v7, 17  ;;  %vm434_vm4 = vcmp.lt.s32.totalorder %v3745_v7, 15  ;;  %v3480_v58 = vld [vmem:[%s4384_s1 + $0xc] sm:$0xf]  ;;  %vm637_vm5 = vcmp.lt.s32.totalorder %v3745_v7, 1 }
   0xb   :  { %v3763_v16 = vrot.slane %v3458_v12, %v3747_v8  ;;  %v3766_v17 = vrot.slane %v3458_v12, %v3749_v9  ;;  %v3769_v18 = vrot.slane %v3458_v12, %v3751_v10  ;;  %v3772_v19 = vrot.slane %v3458_v12, %v3753_v11  ;;  %s3450_s11 = sshll.u32 %s3635_s10, 4  ;;  %s3451_s11 = int_to_ptr.vmem [resolvable:$true] %s3450_s11 }
   0xc   :  { %v3776_v22 = vrot.slane %v41_v15, %v3753_v11  ;;  %v3800_v35 = vrot.slane %v41_v15, %v3747_v8  ;;  %v3804_v37 = vrot.slane %v41_v15, %v3749_v9  ;;  %v3807_v38 = vrot.slane %v41_v15, %v3751_v10  ;;  %s3604_s14 = scalar_lea.vmem %s3451_s11, 256  ;;  %p3609_p1 = scmp.lt.s32.totalorder %s3451_s11, %s3451_s11 }
   0xd   :  { %v3828_v48 = vrot.slane %v3472_v39, %v3753_v11  ;;  %v3839_v53 = vrot.slane %v3472_v39, %v3747_v8  ;;  %v3845_v55 = vrot.slane %v3472_v39, %v3749_v9  ;;  %v3848_v56 = vrot.slane %v3472_v39, %v3751_v10  ;;  %p3605_p0 = scmp.ne.s32.totalorder %s3451_s11, %s3604_s14  ;;  %p3610_p2 = scmp.lt.s32.totalorder %s3604_s14, %s3604_s14 }
   0xe   :  { %32 = vrot.lane.b32.xlu1 %v3677_v2, %s3628_s20  ;;  %30 = vrot.lane.b32.xlu0 %v3664_v0, %s3628_s20  ;;  %v3858_v59 = vrot.slane %v3488_v50, %v3747_v8  ;;  %v3861_v60 = vrot.slane %v3488_v50, %v3753_v11  ;;  %v3867_v63 = vrot.slane %v3488_v50, %v3749_v9  ;;  %vm1032_vm6 = vcmp.lt.s32.totalorder %v3745_v7, 127 }
   0xf   :  { %v3870_v5 = vrot.slane %v3488_v50, %v3751_v10  ;;  %vm1235_vm7 = vcmp.lt.s32.totalorder %v3745_v7, 113  ;;  %vm1438_vm8 = vcmp.lt.s32.totalorder %v3745_v7, 112  ;;  %vm1641_vm9 = vcmp.lt.s32.totalorder %v3745_v7, 111  ;;  %p3611_p3 = por %p3610_p2, %p3609_p1 }
  0x11   :  { %p3612_p4 = pnand %p3611_p3, %p3605_p0 }
  0x12   :  { %428 = vrot.lane.b32.xlu1 %v3681_v3, %s3629_s21  ;;  %426 = vrot.lane.b32.xlu0 %v3669_v1, %s3629_s21 }
  0x16   :  { %432 = vrot.lane.b32.xlu1 %v3677_v2, %s3629_s21  ;;  %430 = vrot.lane.b32.xlu0 %v3664_v0, %s3629_s21 }
  0x1a   :  { %631 = vrot.lane.b32.xlu1 %v3681_v3, %s3630_s22  ;;  %629 = vrot.lane.b32.xlu0 %v3669_v1, %s3630_s22 }
  0x1e   :  { %635 = vrot.lane.b32.xlu1 %v3677_v2, %s3630_s22  ;;  %633 = vrot.lane.b32.xlu0 %v3664_v0, %s3630_s22 }
  0x22   :  { %1026 = vrot.lane.b32.xlu1 %v3681_v3, %s3631_s23  ;;  %1024 = vrot.lane.b32.xlu0 %v3669_v1, %s3631_s23 }
  0x26   :  { %1030 = vrot.lane.b32.xlu1 %v3677_v2, %s3631_s23  ;;  %1028 = vrot.lane.b32.xlu0 %v3664_v0, %s3631_s23 }
  0x2a   :  { %1229 = vrot.lane.b32.xlu1 %v3681_v3, %s3632_s24  ;;  %1227 = vrot.lane.b32.xlu0 %v3669_v1, %s3632_s24 }
  0x2e   :  { %1233 = vrot.lane.b32.xlu1 %v3677_v2, %s3632_s24  ;;  %1231 = vrot.lane.b32.xlu0 %v3664_v0, %s3632_s24 }
  0x32   :  { %1432 = vrot.lane.b32.xlu1 %v3681_v3, %s3633_s25  ;;  %1430 = vrot.lane.b32.xlu0 %v3669_v1, %s3633_s25 }
  0x36   :  { %1436 = vrot.lane.b32.xlu1 %v3677_v2, %s3633_s25  ;;  %1434 = vrot.lane.b32.xlu0 %v3664_v0, %s3633_s25 }
  0x3a   :  { %1635 = vrot.lane.b32.xlu1 %v3681_v3, %s3634_s26  ;;  %1633 = vrot.lane.b32.xlu0 %v3669_v1, %s3634_s26 }
  0x3e   :  { %1639 = vrot.lane.b32.xlu1 %v3677_v2, %s3634_s26  ;;  %1637 = vrot.lane.b32.xlu0 %v3664_v0, %s3634_s26 }
  0x74   :  { %v73_v13 = vpop.permute.xlu1 %72  ;;  %v69_v14 = vpop.permute.xlu0 %68 }
  0x78   :  { %v75_v20 = vpop.permute.xlu1 %74  ;;  %v71_v21 = vpop.permute.xlu0 %70 }
  0x79   :  { %v77_v23 = vsel %vm76_vm0, %v73_v13, %v75_v20  ;;  %v80_v24 = vsel %vm76_vm0, %v75_v20, %v69_v14  ;;  %v78_v25 = vsel %vm76_vm0, %v71_v21, %v73_v13  ;;  %v79_v26 = vsel %vm76_vm0, %v69_v14, %v71_v21 }
  0x7a   :  { %v104_v27 = vmul.f32 %v3763_v16, %v80_v24  ;;  %v106_v28 = vmul.f32 %v3766_v17, %v78_v25  ;;  %v107_v29 = vmul.f32 %v3769_v18, %v77_v23  ;;  %v105_v30 = vmul.f32 %v3772_v19, %v79_v26  ;;  %v3473_v23 = vld [vmem:[%s4385_s2 + $0x8] sm:$0xf] }
  0x7b   :  { %v3879_v14 = vrot.slane %v3480_v58, %v3753_v11  ;;  %v855_v24 = vcombine.low %v3858_v59, %v3861_v60 }
  0x7c   :  { %3463 = vmatprep.subr.msk.mxu1 %vm114_vm1, %v107_v29  ;;  %v29_v32 = vpop.permute.xlu1 %28  ;;  %3460 = vmatprep.subr.msk.mxu0 %vm114_vm1, %v105_v30  ;;  %v27_v33 = vpop.permute.xlu0 %26  ;;  %v3897_v29 = vrot.slane %v3480_v58, %v3747_v8  ;;  %v3900_v30 = vrot.slane %v3480_v58, %v3749_v9 }
  0x7d   :  { %v39_v34 = vsel %vm36_vm2, %v27_v33, %v29_v32  ;;  %3461 = vmatpush1.msk.msra.mxu0 %vm114_vm1, %v104_v27  ;;  %3464 = vmatpush1.msk.msra.mxu1 %vm114_vm1, %v106_v28  ;;  %v856_v27 = vcombine.low %v3867_v63, %v3870_v5 }
  0x7e   :  { %v64_v36 = vmul.f32 %v3776_v22, %v39_v34  ;;  %3462 = vmatmul.mubr.msk.f32.vlgmr.msra.gmra.mxu0 %vm110_vm3, %v3459_v31  ;;  %3465 = vmatmul.mubr.msk.f32.vlgmr.msra.gmra.mxu1 %vm110_vm3, %v3459_v31 }
  0x7f   :  { %348 = vmatprep.mubr.f32.mxu0 %v4388_v4  ;;  %419 = vmatprep.mubr.f32.mxu1 %v4388_v4  ;;  %v860_v39 = vmul.f32 %v856_v27, %v3664_v0  ;;  %v3504_v27 = vld [vmem:[%s4384_s1 + $0x18] sm:$0xf] }
  0x80   :  { %v33_v40 = vpop.permute.xlu1 %32  ;;  %3466 = vmatprep.subr.msk.mxu0 %vm114_vm1, %v64_v36  ;;  %v31_v41 = vpop.permute.xlu0 %30 }
  0x81   :  { %v40_v42 = vsel %vm36_vm2, %v33_v40, %v27_v33  ;;  %v37_v43 = vsel %vm36_vm2, %v31_v41, %v33_v40  ;;  %v38_v44 = vsel %vm36_vm2, %v29_v32, %v31_v41  ;;  %v3905_v32 = vrot.slane %v3480_v58, %v3751_v10 }
  0x82   :  { %v63_v45 = vmul.f32 %v3800_v35, %v40_v42  ;;  %v65_v46 = vmul.f32 %v3804_v37, %v38_v44  ;;  %v66_v47 = vmul.f32 %v3807_v38, %v37_v43  ;;  %v859_v33 = vmul.f32 %v855_v24, %v3669_v1 }
  0x83   :  { %v866_v50 = vcombine.high %v860_v39, %v860_v39 }
  0x84   :  { %v429_v51 = vpop.permute.xlu1 %428  ;;  %3467 = vmatpush1.msk.msra.mxu0 %vm114_vm1, %v63_v45  ;;  %3469 = vmatprep.subr.msk.mxu1 %vm114_vm1, %v66_v47  ;;  %v427_v52 = vpop.permute.xlu0 %426  ;;  %v3481_v45 = vld [vmem:[%s4385_s2 + $0xc] sm:$0xf]  ;;  %v865_v0 = vcombine.high %v859_v33, %v859_v33  ;;  %v3496_v47 = vld [vmem:[%s4384_s1 + $0x14] sm:$0xf] }
  0x85   :  { %v437_v54 = vsel %vm434_vm4, %v427_v52, %v429_v51  ;;  %3470 = vmatpush1.msk.msra.mxu1 %vm114_vm1, %v65_v46  ;;  %3468 = vmatmul.mubr.msk.f32.vlgmr.msra.gmra.mxu0 %vm110_vm3, %v67_v49  ;;  %v3948_v58 = vrot.slane %v3496_v47, %v3747_v8 }
  0x86   :  { %v463_v57 = vmul.f32 %v3828_v48, %v437_v54  ;;  %3471 = vmatmul.mubr.msk.f32.vlgmr.msra.gmra.mxu1 %vm110_vm3, %v67_v49  ;;  %547 = vmatprep.mubr.f32.mxu0 %v4388_v4  ;;  %v3942_v54 = vrot.slane %v3496_v47, %v3749_v9 }
  0x87   :  { %618 = vmatprep.mubr.f32.mxu1 %v4388_v4 }
  0x88   :  { %v433_v61 = vpop.permute.xlu1 %432  ;;  %3474 = vmatprep.subr.msk.mxu0 %vm114_vm1, %v463_v57  ;;  %v431_v62 = vpop.permute.xlu0 %430  ;;  %v3489_v57 = vld [vmem:[%s4385_s2 + $0x10] sm:$0xf] }
  0x89   :  { %v438_v6 = vsel %vm434_vm4, %v433_v61, %v427_v52  ;;  %v435_v12 = vsel %vm434_vm4, %v431_v62, %v433_v61  ;;  %v436_v13 = vsel %vm434_vm4, %v429_v51, %v431_v62  ;;  %v3934_v51 = vrot.slane %v3496_v47, %v3751_v10 }
  0x8a   :  { %v462_v15 = vmul.f32 %v3839_v53, %v438_v6  ;;  %v464_v20 = vmul.f32 %v3845_v55, %v436_v13  ;;  %v465_v21 = vmul.f32 %v3848_v56, %v435_v12  ;;  %v3939_v52 = vrot.slane %v3496_v47, %v3753_v11  ;;  %v3505_v47 = vld [vmem:[%s4385_s2 + $0x18] sm:$0xf] }
  0x8b   :  { %4407 = vst [vmem:[#allocation7_spill] sm:$0xff] %v3934_v51 }
  0x8c   :  { %v632_v25 = vpop.permute.xlu1 %631  ;;  %3475 = vmatpush1.msk.msra.mxu0 %vm114_vm1, %v462_v15  ;;  %3477 = vmatprep.subr.msk.mxu1 %vm114_vm1, %v465_v21  ;;  %v630_v26 = vpop.permute.xlu0 %629 }
  0x8d   :  { %v640_v28 = vsel %vm637_vm5, %v630_v26, %v632_v25  ;;  %3478 = vmatpush1.msk.msra.mxu1 %vm114_vm1, %v464_v20  ;;  %3476 = vmatmul.mubr.msk.f32.vlgmr.msra.gmra.mxu0 %vm110_vm3, %v3473_v23 }
  0x8e   :  { %v666_v31 = vmul.f32 %v3879_v14, %v640_v28  ;;  %3479 = vmatmul.mubr.msk.f32.vlgmr.msra.gmra.mxu1 %vm110_vm3, %v3473_v23  ;;  %750 = vmatprep.mubr.f32.mxu0 %v4388_v4 }
  0x8f   :  { %821 = vmatprep.mubr.f32.mxu1 %v4388_v4 }
  0x90   :  { %v636_v34 = vpop.permute.xlu1 %635  ;;  %3482 = vmatprep.subr.msk.mxu0 %vm114_vm1, %v666_v31  ;;  %v634_v36 = vpop.permute.xlu0 %633  ;;  %v3984_v31 = vrot.slane %v3504_v27, %v3751_v10 }
  0x91   :  { %v641_v40 = vsel %vm637_vm5, %v636_v34, %v630_v26  ;;  %v638_v41 = vsel %vm637_vm5, %v634_v36, %v636_v34  ;;  %v639_v42 = vsel %vm637_vm5, %v632_v25, %v634_v36  ;;  %v3497_v25 = vld [vmem:[%s4385_s2 + $0x14] sm:$0xf]  ;;  %v3991_v34 = vrot.slane %v3504_v27, %v3749_v9 }
  0x92   :  { %v665_v43 = vmul.f32 %v3897_v29, %v641_v40  ;;  %v667_v1 = vmul.f32 %v3900_v30, %v639_v42  ;;  %v668_v44 = vmul.f32 %v3905_v32, %v638_v41  ;;  %4408 = vst [vmem:[#allocation8_spill] sm:$0xff] %v3984_v31  ;;  %v3994_v36 = vrot.slane %v3504_v27, %v3747_v8 }
  0x93   :  { %4410 = vst [vmem:[#allocation10_spill] sm:$0xff] %v3991_v34 }
  0x94   :  { %v1027_v46 = vpop.permute.xlu1 %1026  ;;  %3483 = vmatpush1.msk.msra.mxu0 %vm114_vm1, %v665_v43  ;;  %3485 = vmatprep.subr.msk.mxu1 %vm114_vm1, %v668_v44  ;;  %v1025_v49 = vpop.permute.xlu0 %1024  ;;  %4411 = vst [vmem:[#allocation11_spill] sm:$0xff] %v3994_v36 }
  0x95   :  { %3486 = vmatpush1.msk.msra.mxu1 %vm114_vm1, %v667_v1  ;;  %3484 = vmatmul.mubr.msk.f32.vlgmr.msra.gmra.mxu0 %vm110_vm3, %v3481_v45  ;;  %v1035_v61 = vsel %vm1032_vm6, %v1025_v49, %v1027_v46 }
  0x96   :  { %3487 = vmatmul.mubr.msk.f32.vlgmr.msra.gmra.mxu1 %vm110_vm3, %v3481_v45  ;;  %3490 = vmatprep.subr.msk.mxu0 %vm114_vm1, %v865_v0  ;;  %v1060_v24 = vmul.f32 %v3948_v58, %v1035_v61 }
  0x97   :  { %3491 = vmatpush1.msk.msra.mxu0 %vm114_vm1, %v859_v33  ;;  %942 = vmatprep.mubr.f32.mxu0 %v4388_v4  ;;  %v3988_v33 = vrot.slane %v3504_v27, %v3753_v11 }
  0x98   :  { %v1031_v62 = vpop.permute.xlu1 %1030  ;;  %v1029_v6 = vpop.permute.xlu0 %1028  ;;  %3493 = vmatprep.subr.msk.mxu1 %vm114_vm1, %v866_v50  ;;  %1013 = vmatprep.mubr.f32.mxu1 %v4388_v4  ;;  %v3512_v50 = vld [vmem:[%s4384_s1 + $0x1c] sm:$0xf] }
  0x99   :  { %v1036_v12 = vsel %vm1032_vm6, %v1031_v62, %v1025_v49  ;;  %v1033_v13 = vsel %vm1032_vm6, %v1029_v6, %v1031_v62  ;;  %v1034_v15 = vsel %vm1032_vm6, %v1027_v46, %v1029_v6  ;;  %3492 = vmatmul.mubr.msk.f32.vlgmr.msra.gmra.mxu0 %vm110_vm3, %v3489_v57  ;;  %3494 = vmatpush1.msk.msra.mxu1 %vm114_vm1, %v860_v39 }
  0x9a   :  { %v1063_v20 = vmul.f32 %v3934_v51, %v1036_v12  ;;  %v1061_v21 = vmul.f32 %v3939_v52, %v1034_v15  ;;  %v1062_v23 = vmul.f32 %v3942_v54, %v1033_v13  ;;  %3495 = vmatmul.mubr.msk.f32.vlgmr.msra.gmra.mxu1 %vm110_vm3, %v3489_v57  ;;  %1145 = vmatprep.mubr.f32.mxu0 %v4388_v4 }
  0x9b   :  { %1216 = vmatprep.mubr.f32.mxu1 %v4388_v4  ;;  %4409 = vst [vmem:[#allocation9_spill] sm:$0xff] %v3988_v33  ;;  %v4024_v61 = vrot.slane %v3512_v50, %v3751_v10  ;;  %v4027_v62 = vrot.slane %v3512_v50, %v3753_v11  ;;  %v4030_v6 = vrot.slane %v3512_v50, %v3749_v9 }
  0x9c   :  { %v1230_v26 = vpop.permute.xlu1 %1229  ;;  %3498 = vmatprep.subr.msk.mxu0 %vm114_vm1, %v1061_v21  ;;  %3501 = vmatprep.subr.msk.mxu1 %vm114_vm1, %v1063_v20  ;;  %v1228_v28 = vpop.permute.xlu0 %1227  ;;  %v4033_v12 = vrot.slane %v3512_v50, %v3747_v8 }
  0x9d   :  { %3499 = vmatpush1.msk.msra.mxu0 %vm114_vm1, %v1060_v24  ;;  %3502 = vmatpush1.msk.msra.mxu1 %vm114_vm1, %v1062_v23  ;;  %v1238_v39 = vsel %vm1235_vm7, %v1228_v28, %v1230_v26  ;;  %4412 = vst [vmem:[#allocation12_spill] sm:$0xff] %v4024_v61  ;;  %4413 = vst [vmem:[#allocation13_spill] sm:$0xff] %v4027_v62 }
  0x9e   :  { %3500 = vmatmul.mubr.msk.f32.vlgmr.msra.gmra.mxu0 %vm110_vm3, %v3497_v25  ;;  %3503 = vmatmul.mubr.msk.f32.vlgmr.msra.gmra.mxu1 %vm110_vm3, %v3497_v25  ;;  %v1263_v46 = vmul.f32 %v3994_v36, %v1238_v39  ;;  %4414 = vst [vmem:[#allocation14_spill] sm:$0xff] %v4030_v6  ;;  %4415 = vst [vmem:[#allocation15_spill] sm:$0xff] %v4033_v12  ;;  %v3513_v39 = vld [vmem:[%s4385_s2 + $0x1c] sm:$0xf] }
  0x9f   :  { %1348 = vmatprep.mubr.f32.mxu0 %v4388_v4  ;;  %1419 = vmatprep.mubr.f32.mxu1 %v4388_v4 }
  0xa0   :  { %v1234_v40 = vpop.permute.xlu1 %1233  ;;  %v1232_v41 = vpop.permute.xlu0 %1231 }
  0xa1   :  { %v1239_v42 = vsel %vm1235_vm7, %v1234_v40, %v1228_v28  ;;  %v1236_v43 = vsel %vm1235_vm7, %v1232_v41, %v1234_v40  ;;  %v1237_v1 = vsel %vm1235_vm7, %v1230_v26, %v1232_v41  ;;  %v3520_v41 = vld [vmem:[%s4384_s1 + $0x20] sm:$0xf] }
  0xa2   :  { %v1266_v44 = vmul.f32 %v3984_v31, %v1239_v42  ;;  %v1264_v45 = vmul.f32 %v3988_v33, %v1237_v1  ;;  %v1265_v0 = vmul.f32 %v3991_v34, %v1236_v43  ;;  %v4063_v43 = vrot.slane %v3520_v41, %v3751_v10 }
  0xa3   :  { %v4066_v1 = vrot.slane %v3520_v41, %v3753_v11 }
  0xa4   :  { %v1433_v49 = vpop.permute.xlu1 %1432  ;;  %3506 = vmatprep.subr.msk.mxu0 %vm114_vm1, %v1264_v45  ;;  %3509 = vmatprep.subr.msk.mxu1 %vm114_vm1, %v1266_v44  ;;  %v1431_v57 = vpop.permute.xlu0 %1430  ;;  %4416 = vst [vmem:[#allocation16_spill] sm:$0xff] %v4063_v43  ;;  %v4069_v44 = vrot.slane %v3520_v41, %v3749_v9  ;;  %v4072_v45 = vrot.slane %v3520_v41, %v3747_v8 }
  0xa5   :  { %3507 = vmatpush1.msk.msra.mxu0 %vm114_vm1, %v1263_v46  ;;  %3510 = vmatpush1.msk.msra.mxu1 %vm114_vm1, %v1265_v0  ;;  %v1441_v13 = vsel %vm1438_vm8, %v1431_v57, %v1433_v49  ;;  %4417 = vst [vmem:[#allocation17_spill] sm:$0xff] %v4066_v1 }
  0xa6   :  { %3508 = vmatmul.mubr.msk.f32.vlgmr.msra.gmra.mxu0 %vm110_vm3, %v3505_v47  ;;  %3511 = vmatmul.mubr.msk.f32.vlgmr.msra.gmra.mxu1 %vm110_vm3, %v3505_v47  ;;  %v1466_v28 = vmul.f32 %v4033_v12, %v1441_v13  ;;  %4418 = vst [vmem:[#allocation18_spill] sm:$0xff] %v4069_v44  ;;  %4419 = vst [vmem:[#allocation19_spill] sm:$0xff] %v4072_v45  ;;  %v3521_v13 = vld [vmem:[%s4385_s2 + $0x20] sm:$0xf] }
  0xa7   :  { %1551 = vmatprep.mubr.f32.mxu0 %v4388_v4  ;;  %1622 = vmatprep.mubr.f32.mxu1 %v4388_v4 }
  0xa8   :  { %v1437_v15 = vpop.permute.xlu1 %1436  ;;  %v1435_v20 = vpop.permute.xlu0 %1434 }
  0xa9   :  { %v1442_v21 = vsel %vm1438_vm8, %v1437_v15, %v1431_v57  ;;  %v1439_v23 = vsel %vm1438_vm8, %v1435_v20, %v1437_v15  ;;  %v1440_v24 = vsel %vm1438_vm8, %v1433_v49, %v1435_v20 }
  0xaa   :  { %v1469_v25 = vmul.f32 %v4024_v61, %v1442_v21  ;;  %v1467_v26 = vmul.f32 %v4027_v62, %v1440_v24  ;;  %v1468_v27 = vmul.f32 %v4030_v6, %v1439_v23 }
  0xac   :  { %v1636_v40 = vpop.permute.xlu1 %1635  ;;  %3514 = vmatprep.subr.msk.mxu0 %vm114_vm1, %v1467_v26  ;;  %3517 = vmatprep.subr.msk.mxu1 %vm114_vm1, %v1469_v25  ;;  %v1634_v42 = vpop.permute.xlu0 %1633 }
  0xad   :  { %3515 = vmatpush1.msk.msra.mxu0 %vm114_vm1, %v1466_v28  ;;  %3518 = vmatpush1.msk.msra.mxu1 %vm114_vm1, %v1468_v27  ;;  %v1644_v0 = vsel %vm1641_vm9, %v1634_v42, %v1636_v40 }
  0xae   :  { %3516 = vmatmul.mubr.msk.f32.vlgmr.msra.gmra.mxu0 %vm110_vm3, %v3513_v39  ;;  %3519 = vmatmul.mubr.msk.f32.vlgmr.msra.gmra.mxu1 %vm110_vm3, %v3513_v39  ;;  %v1669_v57 = vmul.f32 %v4072_v45, %v1644_v0 }
  0xaf   :  { %1754 = vmatprep.mubr.f32.mxu0 %v4388_v4  ;;  %1825 = vmatprep.mubr.f32.mxu1 %v4388_v4 }
  0xb0   :  { %v1640_v46 = vpop.permute.xlu1 %1639  ;;  %v1638_v47 = vpop.permute.xlu0 %1637 }
  0xb1   :  { %v1645_v10 = vsel %vm1641_vm9, %v1640_v46, %v1634_v42  ;;  %v1642_v11 = vsel %vm1641_vm9, %v1638_v47, %v1640_v46  ;;  %v1643_v9 = vsel %vm1641_vm9, %v1636_v40, %v1638_v47 }
  0xb2   :  { %v1672_v8 = vmul.f32 %v4063_v43, %v1645_v10  ;;  %v1670_v49 = vmul.f32 %v4066_v1, %v1643_v9  ;;  %v1671_v50 = vmul.f32 %v4069_v44, %v1642_v11 }
  0xb4   :  { %3522 = vmatprep.subr.msk.mxu0 %vm114_vm1, %v1670_v49  ;;  %3525 = vmatprep.subr.msk.mxu1 %vm114_vm1, %v1672_v8 }
  0xb5   :  { %3523 = vmatpush1.msk.msra.mxu0 %vm114_vm1, %v1669_v57  ;;  %3526 = vmatpush1.msk.msra.mxu1 %vm114_vm1, %v1671_v50 }
  0xb6   :  { %3524 = vmatmul.mubr.msk.f32.vlgmr.msra.gmra.mxu0 %vm110_vm3, %v3521_v13  ;;  %3527 = vmatmul.mubr.msk.f32.vlgmr.msra.gmra.mxu1 %vm110_vm3, %v3521_v13 }
  0xb7   :  { %1954 = vmatprep.mubr.f32.mxu0 %v4388_v4  ;;  %2025 = vmatprep.mubr.f32.mxu1 %v4388_v4 }
 0x13e   :  { %v193_v15 = vpop.f32.mrf.mxu0  ;;  %v264_v20 = vpop.f32.mrf.mxu1 }
 0x140   :  { %v195_v21 = vpop.f32.mrf.mxu0  ;;  %v266_v23 = vpop.f32.mrf.mxu1 }
 0x145   :  { %v350_v24 = vpop.f32.mrf.mxu0 }
 0x146   :  { %v421_v25 = vpop.f32.mrf.mxu1  ;;  %v351_v49 = vadd.f32 %v350_v24, %v193_v15 }
 0x147   :  { %v352_v26 = vpop.f32.mrf.mxu0  ;;  %v422_v50 = vadd.f32 %v421_v25, %v264_v20 }
 0x148   :  { %v423_v27 = vpop.f32.mrf.mxu1  ;;  %v353_v4 = vadd.f32 %v352_v26, %v195_v21 }
 0x149   :  { %v424_v2 = vadd.f32 %v423_v27, %v266_v23 }
 0x14d   :  { %v549_v28 = vpop.f32.mrf.mxu0 }
 0x14e   :  { %v620_v39 = vpop.f32.mrf.mxu1  ;;  %v625_v3 = vadd.f32 %v549_v28, %v351_v49 }
 0x14f   :  { %v551_v40 = vpop.f32.mrf.mxu0  ;;  %v627_v43 = vadd.f32 %v620_v39, %v422_v50 }
 0x150   :  { %v622_v41 = vpop.f32.mrf.mxu1  ;;  %v626_v1 = vadd.f32 %v551_v40, %v353_v4 }
 0x151   :  { %v628_v61 = vadd.f32 %v622_v41, %v424_v2 }
 0x155   :  { %v752_v42 = vpop.f32.mrf.mxu0 }
 0x156   :  { %v823_v0 = vpop.f32.mrf.mxu1  ;;  %v828_v6 = vadd.f32 %v752_v42, %v625_v3 }
 0x157   :  { %v754_v46 = vpop.f32.mrf.mxu0  ;;  %v830_v31 = vadd.f32 %v823_v0, %v627_v43 }
 0x158   :  { %v825_v47 = vpop.f32.mrf.mxu1  ;;  %v829_v34 = vadd.f32 %v754_v46, %v626_v1 }
 0x159   :  { %v944_v10 = vpop.f32.mrf.mxu0  ;;  %v831_v36 = vadd.f32 %v825_v47, %v628_v61 }
 0x15a   :  { %v1015_v11 = vpop.f32.mrf.mxu1  ;;  %v1020_v33 = vadd.f32 %v944_v10, %v828_v6 }
 0x15b   :  { %v946_v9 = vpop.f32.mrf.mxu0  ;;  %v1022_v20 = vadd.f32 %v1015_v11, %v830_v31 }
 0x15c   :  { %v1017_v8 = vpop.f32.mrf.mxu1  ;;  %v1021_v21 = vadd.f32 %v946_v9, %v829_v34 }
 0x15d   :  { %v1023_v23 = vadd.f32 %v1017_v8, %v831_v36 }
 0x15e   :  { %v1147_v57 = vpop.f32.mrf.mxu0  ;;  %v1218_v13 = vpop.f32.mrf.mxu1 }
 0x15f   :  { %v1223_v26 = vadd.f32 %v1147_v57, %v1020_v33  ;;  %v1225_v28 = vadd.f32 %v1218_v13, %v1022_v20 }
 0x160   :  { %v1149_v44 = vpop.f32.mrf.mxu0  ;;  %v1220_v45 = vpop.f32.mrf.mxu1 }
 0x161   :  { %v1224_v27 = vadd.f32 %v1149_v44, %v1021_v21  ;;  %v1226_v3 = vadd.f32 %v1220_v45, %v1023_v23 }
 0x166   :  { %v1350_v12 = vpop.f32.mrf.mxu0  ;;  %v1421_v62 = vpop.f32.mrf.mxu1 }
 0x167   :  { %v1426_v39 = vadd.f32 %v1350_v12, %v1223_v26  ;;  %v1428_v40 = vadd.f32 %v1421_v62, %v1225_v28 }
 0x168   :  { %v1352_v51 = vpop.f32.mrf.mxu0  ;;  %v1423_v15 = vpop.f32.mrf.mxu1 }
 0x169   :  { %v1427_v41 = vadd.f32 %v1352_v51, %v1224_v27  ;;  %v1429_v6 = vadd.f32 %v1423_v15, %v1226_v3  ;;  %v4420_v27 = vmov 0.0  }
 0x16e   :  { %v1553_v24 = vpop.f32.mrf.mxu0  ;;  %v1624_v25 = vpop.f32.mrf.mxu1 }
 0x16f   :  { %v1629_v43 = vadd.f32 %v1553_v24, %v1426_v39  ;;  %v1631_v42 = vadd.f32 %v1624_v25, %v1428_v40  ;;  %v1856_v40 = vld [vmem:[%s4386_s3] sm:$0xf] }
 0x170   :  { %v1555_v4 = vpop.f32.mrf.mxu0  ;;  %v1626_v2 = vpop.f32.mrf.mxu1 }
 0x171   :  { %v1630_v0 = vadd.f32 %v1555_v4, %v1427_v41  ;;  %v1632_v34 = vadd.f32 %v1626_v2, %v1429_v6 }
 0x176   :  { %v1756_v1 = vpop.f32.mrf.mxu0  ;;  %v1827_v61 = vpop.f32.mrf.mxu1 }
 0x177   :  { %v1832_v31 = vadd.f32 %v1756_v1, %v1629_v43  ;;  %v1834_v33 = vadd.f32 %v1827_v61, %v1631_v42 }
 0x178   :  { %v1758_v46 = vpop.f32.mrf.mxu0  ;;  %v1829_v47 = vpop.f32.mrf.mxu1 }
 0x179   :  { %v4099_v36 = vmax.f32 %v1832_v31, 0.0  ;;  %v1833_v44 = vadd.f32 %v1758_v46, %v1630_v0  ;;  %v1835_v10 = vadd.f32 %v1829_v47, %v1632_v34  ;;  %v4105_v51 = vmax.f32 %v1834_v33, 0.0  ;;  %v3541_v46 = vld [vmem:[%s4386_s3 + $0x8] sm:$0xf] }
 0x17b   :  { %v4101_v12 = vmax.f32 %v1833_v44, 0.0  ;;  %1857 = vrot.lane.b32.xlu0 %v4099_v36, %s3626_s19  ;;  %v4109_v62 = vmax.f32 %v1835_v10, 0.0 }
 0x17d   :  { %1859 = vrot.lane.b32.xlu1 %v4101_v12, %s3626_s19 }
 0x17f   :  { %1861 = vrot.lane.b32.xlu0 %v4105_v51, %s3626_s19 }
 0x181   :  { %1863 = vrot.lane.b32.xlu1 %v4109_v62, %s3626_s19 }
 0x183   :  { %1840 = vrot.lane.b32.xlu0 %v4099_v36, %s3628_s20 }
 0x185   :  { %1842 = vrot.lane.b32.xlu1 %v4101_v12, %s3628_s20 }
 0x187   :  { %1844 = vrot.lane.b32.xlu0 %v4105_v51, %s3628_s20 }
 0x189   :  { %1846 = vrot.lane.b32.xlu1 %v4109_v62, %s3628_s20 }
 0x18b   :  { %2189 = vrot.lane.b32.xlu0 %v4099_v36, %s3629_s21 }
 0x18d   :  { %2191 = vrot.lane.b32.xlu1 %v4101_v12, %s3629_s21 }
 0x18f   :  { %2193 = vrot.lane.b32.xlu0 %v4105_v51, %s3629_s21 }
 0x191   :  { %2195 = vrot.lane.b32.xlu1 %v4109_v62, %s3629_s21 }
 0x193   :  { %2368 = vrot.lane.b32.xlu0 %v4099_v36, %s3630_s22 }
 0x195   :  { %2370 = vrot.lane.b32.xlu1 %v4101_v12, %s3630_s22 }
 0x197   :  { %2372 = vrot.lane.b32.xlu0 %v4105_v51, %s3630_s22 }
 0x199   :  { %2374 = vrot.lane.b32.xlu1 %v4109_v62, %s3630_s22 }
 0x19b   :  { %2714 = vrot.lane.b32.xlu0 %v4099_v36, %s3631_s23 }
 0x19d   :  { %2716 = vrot.lane.b32.xlu1 %v4101_v12, %s3631_s23 }
 0x19f   :  { %2718 = vrot.lane.b32.xlu0 %v4105_v51, %s3631_s23 }
 0x1a1   :  { %2720 = vrot.lane.b32.xlu1 %v4109_v62, %s3631_s23 }
 0x1a3   :  { %2893 = vrot.lane.b32.xlu0 %v4099_v36, %s3632_s24 }
 0x1a5   :  { %2895 = vrot.lane.b32.xlu1 %v4101_v12, %s3632_s24 }
 0x1a7   :  { %2897 = vrot.lane.b32.xlu0 %v4105_v51, %s3632_s24 }
 0x1a9   :  { %2899 = vrot.lane.b32.xlu1 %v4109_v62, %s3632_s24 }
 0x1ab   :  { %3072 = vrot.lane.b32.xlu0 %v4099_v36, %s3633_s25 }
 0x1ad   :  { %3074 = vrot.lane.b32.xlu1 %v4101_v12, %s3633_s25 }
 0x1af   :  { %3076 = vrot.lane.b32.xlu0 %v4105_v51, %s3633_s25 }
 0x1b1   :  { %3078 = vrot.lane.b32.xlu1 %v4109_v62, %s3633_s25 }
 0x1b3   :  { %3251 = vrot.lane.b32.xlu0 %v4099_v36, %s3634_s26 }
 0x1b5   :  { %3253 = vrot.lane.b32.xlu1 %v4101_v12, %s3634_s26 }
 0x1b7   :  { %3255 = vrot.lane.b32.xlu0 %v4105_v51, %s3634_s26 }
 0x1b9   :  { %3257 = vrot.lane.b32.xlu1 %v4109_v62, %s3634_s26 }
 0x1ed   :  { %v1858_v45 = vpop.permute.xlu0 %1857 }
 0x1ef   :  { %v1860_v11 = vpop.permute.xlu1 %1859 }
 0x1f0   :  { %v1867_v9 = vsel %vm76_vm0, %v1858_v45, %v1860_v11 }
 0x1f1   :  { %v1870_v8 = vmul.f32 %v1867_v9, %v3772_v19  ;;  %v1862_v49 = vpop.permute.xlu0 %1861  ;;  %v3528_v19 = vld [vmem:[%s4386_s3 + $0x4] sm:$0xf] }
 0x1f2   :  { %v1866_v50 = vsel %vm76_vm0, %v1860_v11, %v1862_v49 }
 0x1f3   :  { %3529 = vmatprep.subr.msk.mxu0 %vm114_vm1, %v1870_v8  ;;  %v1864_v57 = vpop.permute.xlu1 %1863  ;;  %v1871_v21 = vmul.f32 %v1866_v50, %v3766_v17  ;;  %v3548_v50 = vld [vmem:[%s4386_s3 + $0xc] sm:$0xf] }
 0x1f4   :  { %v1865_v13 = vsel %vm76_vm0, %v1862_v49, %v1864_v57  ;;  %v1868_v15 = vsel %vm76_vm0, %v1864_v57, %v1858_v45  ;;  %v2548_v49 = vmul.f32 %v4101_v12, %v3861_v60  ;;  %v2549_v12 = vmul.f32 %v4105_v51, %v3867_v63 }
 0x1f5   :  { %v1869_v20 = vmul.f32 %v1868_v15, %v3763_v16  ;;  %v1872_v24 = vmul.f32 %v1865_v13, %v3769_v18  ;;  %v1841_v25 = vpop.permute.xlu0 %1840 }
 0x1f7   :  { %3530 = vmatpush1.msk.msra.mxu0 %vm114_vm1, %v1869_v20  ;;  %3532 = vmatprep.subr.msk.mxu1 %vm114_vm1, %v1872_v24  ;;  %v1843_v23 = vpop.permute.xlu1 %1842  ;;  %v4421_v20 = vld [vmem:[#allocation7_spill] sm:$0xff] }
 0x1f8   :  { %v1850_v26 = vsel %vm36_vm2, %v1841_v25, %v1843_v23  ;;  %3533 = vmatpush1.msk.msra.mxu1 %vm114_vm1, %v1871_v21  ;;  %3531 = vmatmul.mubr.msk.f32.vlgmr.msra.gmra.mxu0 %vm110_vm3, %v3528_v19 }
 0x1f9   :  { %v1853_v16 = vmul.f32 %v1850_v26, %v3776_v22  ;;  %v1845_v18 = vpop.permute.xlu0 %1844  ;;  %3534 = vmatmul.mubr.msk.f32.vlgmr.msra.gmra.mxu1 %vm110_vm3, %v3528_v19  ;;  %2111 = vmatprep.mubr.f32.mxu0 %v4420_v27 }
 0x1fa   :  { %2182 = vmatprep.mubr.f32.mxu1 %v4420_v27  ;;  %v1849_v17 = vsel %vm36_vm2, %v1843_v23, %v1845_v18  ;;  %v4422_v23 = vld [vmem:[#allocation9_spill] sm:$0xff] }
 0x1fb   :  { %3535 = vmatprep.subr.msk.mxu0 %vm114_vm1, %v1853_v16  ;;  %v1847_v28 = vpop.permute.xlu1 %1846  ;;  %v1854_v41 = vmul.f32 %v1849_v17, %v3804_v37 }
 0x1fc   :  { %v1848_v39 = vsel %vm36_vm2, %v1845_v18, %v1847_v28  ;;  %v1851_v4 = vsel %vm36_vm2, %v1847_v28, %v1841_v25  ;;  %v4423_v18 = vld [vmem:[#allocation11_spill] sm:$0xff] }
 0x1fd   :  { %v1852_v22 = vmul.f32 %v1851_v4, %v3800_v35  ;;  %v1855_v2 = vmul.f32 %v1848_v39, %v3807_v38  ;;  %v2190_v3 = vpop.permute.xlu0 %2189  ;;  %v3569_v4 = vld [vmem:[%s4386_s3 + $0x18] sm:$0xf] }
 0x1ff   :  { %3536 = vmatpush1.msk.msra.mxu0 %vm114_vm1, %v1852_v22  ;;  %3538 = vmatprep.subr.msk.mxu1 %vm114_vm1, %v1855_v2  ;;  %v2192_v43 = vpop.permute.xlu1 %2191  ;;  %v4424_v22 = vld [vmem:[#allocation10_spill] sm:$0xff] }
 0x200   :  { %v2199_v1 = vsel %vm434_vm4, %v2190_v3, %v2192_v43  ;;  %3539 = vmatpush1.msk.msra.mxu1 %vm114_vm1, %v1854_v41  ;;  %3537 = vmatmul.mubr.msk.f32.vlgmr.msra.gmra.mxu0 %vm110_vm3, %v1856_v40 }
 0x201   :  { %v2202_v35 = vmul.f32 %v2199_v1, %v3828_v48  ;;  %v2194_v38 = vpop.permute.xlu0 %2193  ;;  %3540 = vmatmul.mubr.msk.f32.vlgmr.msra.gmra.mxu1 %vm110_vm3, %v1856_v40  ;;  %2286 = vmatprep.mubr.f32.mxu0 %v4420_v27 }
 0x202   :  { %2357 = vmatprep.mubr.f32.mxu1 %v4420_v27  ;;  %v2198_v37 = vsel %vm434_vm4, %v2192_v43, %v2194_v38 }
 0x203   :  { %3542 = vmatprep.subr.msk.mxu0 %vm114_vm1, %v2202_v35  ;;  %v2196_v61 = vpop.permute.xlu1 %2195  ;;  %v2203_v47 = vmul.f32 %v2198_v37, %v3845_v55  ;;  %v4426_v37 = vld [vmem:[#allocation13_spill] sm:$0xff] }
 0x204   :  { %v2197_v6 = vsel %vm434_vm4, %v2194_v38, %v2196_v61  ;;  %v2200_v42 = vsel %vm434_vm4, %v2196_v61, %v2190_v3  ;;  %v4425_v3 = vld [vmem:[#allocation8_spill] sm:$0xff] }
 0x205   :  { %v2201_v48 = vmul.f32 %v2200_v42, %v3839_v53  ;;  %v2204_v0 = vmul.f32 %v2197_v6, %v3848_v56  ;;  %v2369_v31 = vpop.permute.xlu0 %2368  ;;  %v4427_v42 = vld [vmem:[#allocation15_spill] sm:$0xff] }
 0x207   :  { %3543 = vmatpush1.msk.msra.mxu0 %vm114_vm1, %v2201_v48  ;;  %3545 = vmatprep.subr.msk.mxu1 %vm114_vm1, %v2204_v0  ;;  %v2371_v34 = vpop.permute.xlu1 %2370 }
 0x208   :  { %v2378_v33 = vsel %vm637_vm5, %v2369_v31, %v2371_v34  ;;  %3546 = vmatpush1.msk.msra.mxu1 %vm114_vm1, %v2203_v47  ;;  %3544 = vmatmul.mubr.msk.f32.vlgmr.msra.gmra.mxu0 %vm110_vm3, %v3541_v46  ;;  %v4428_v47 = vld [vmem:[#allocation14_spill] sm:$0xff] }
 0x209   :  { %v2381_v53 = vmul.f32 %v2378_v33, %v3879_v14  ;;  %v2373_v56 = vpop.permute.xlu0 %2372  ;;  %3547 = vmatmul.mubr.msk.f32.vlgmr.msra.gmra.mxu1 %vm110_vm3, %v3541_v46  ;;  %2465 = vmatprep.mubr.f32.mxu0 %v4420_v27  ;;  %v3576_v46 = vld [vmem:[%s4386_s3 + $0x1c] sm:$0xf]  ;;  %v4429_v33 = vld [vmem:[#allocation12_spill] sm:$0xff] }
 0x20a   :  { %2536 = vmatprep.mubr.f32.mxu1 %v4420_v27  ;;  %v2377_v55 = vsel %vm637_vm5, %v2371_v34, %v2373_v56 }
 0x20b   :  { %3549 = vmatprep.subr.msk.mxu0 %vm114_vm1, %v2381_v53  ;;  %v2375_v44 = vpop.permute.xlu1 %2374  ;;  %v2382_v8 = vmul.f32 %v2377_v55, %v3900_v30  ;;  %v2547_v30 = vmul.f32 %v4099_v36, %v3858_v59  ;;  %v3555_v59 = vld [vmem:[%s4386_s3 + $0x10] sm:$0xf] }
 0x20c   :  { %v2376_v10 = vsel %vm637_vm5, %v2373_v56, %v2375_v44  ;;  %v2379_v45 = vsel %vm637_vm5, %v2375_v44, %v2369_v31 }
 0x20d   :  { %v2380_v14 = vmul.f32 %v2379_v45, %v3897_v29  ;;  %v2383_v11 = vmul.f32 %v2376_v10, %v3905_v32  ;;  %v2715_v9 = vpop.permute.xlu0 %2714  ;;  %v2550_v29 = vmul.f32 %v4109_v62, %v3870_v5 }
 0x20f   :  { %3550 = vmatpush1.msk.msra.mxu0 %vm114_vm1, %v2380_v14  ;;  %3552 = vmatprep.subr.msk.mxu1 %vm114_vm1, %v2383_v11  ;;  %v2717_v57 = vpop.permute.xlu1 %2716  ;;  %v4430_v14 = vld [vmem:[#allocation17_spill] sm:$0xff] }
 0x210   :  { %3553 = vmatpush1.msk.msra.mxu1 %vm114_vm1, %v2382_v8  ;;  %3556 = vmatprep.subr.msk.mxu0 %vm114_vm1, %v2548_v49  ;;  %v2724_v60 = vsel %vm1032_vm6, %v2715_v9, %v2717_v57  ;;  %v4431_v8 = vld [vmem:[#allocation19_spill] sm:$0xff] }
 0x211   :  { %v2719_v32 = vpop.permute.xlu0 %2718  ;;  %3551 = vmatmul.mubr.msk.f32.vlgmr.msra.gmra.mxu0 %vm110_vm3, %v3548_v50  ;;  %3559 = vmatprep.subr.msk.mxu1 %vm114_vm1, %v2550_v29  ;;  %v2726_v63 = vmul.f32 %v2724_v60, %v3948_v58  ;;  %v3562_v58 = vld [vmem:[%s4386_s3 + $0x14] sm:$0xf]  ;;  %v3583_v29 = vld [vmem:[%s4386_s3 + $0x20] sm:$0xf] }
 0x212   :  { %v2723_v5 = vsel %vm1032_vm6, %v2717_v57, %v2719_v32  ;;  %3557 = vmatpush1.msk.msra.mxu0 %vm114_vm1, %v2547_v30  ;;  %3554 = vmatmul.mubr.msk.f32.vlgmr.msra.gmra.mxu1 %vm110_vm3, %v3548_v50  ;;  %v4432_v30 = vld [vmem:[#allocation18_spill] sm:$0xff] }
 0x213   :  { %v2727_v36 = vmul.f32 %v2723_v5, %v3939_v52  ;;  %3560 = vmatpush1.msk.msra.mxu1 %vm114_vm1, %v2549_v12  ;;  %v2721_v62 = vpop.permute.xlu1 %2720  ;;  %2632 = vmatprep.mubr.f32.mxu0 %v4420_v27 }
 0x214   :  { %v2722_v51 = vsel %vm1032_vm6, %v2719_v32, %v2721_v62  ;;  %v2725_v13 = vsel %vm1032_vm6, %v2721_v62, %v2715_v9  ;;  %2703 = vmatprep.mubr.f32.mxu1 %v4420_v27  ;;  %v4433_v32 = vld [vmem:[#allocation16_spill] sm:$0xff] }
 0x215   :  { %v2728_v15 = vmul.f32 %v2722_v51, %v3942_v54  ;;  %v2729_v24 = vmul.f32 %v2725_v13, %v4421_v20  ;;  %v2894_v52 = vpop.permute.xlu0 %2893  ;;  %3563 = vmatprep.subr.msk.mxu0 %vm114_vm1, %v2727_v36  ;;  %3558 = vmatmul.mubr.msk.f32.vlgmr.msra.gmra.mxu0 %vm110_vm3, %v3555_v59 }
 0x216   :  { %3561 = vmatmul.mubr.msk.f32.vlgmr.msra.gmra.mxu1 %vm110_vm3, %v3555_v59  ;;  %3564 = vmatpush1.msk.msra.mxu0 %vm114_vm1, %v2726_v63 }
 0x217   :  { %v2896_v25 = vpop.permute.xlu1 %2895  ;;  %3566 = vmatprep.subr.msk.mxu1 %vm114_vm1, %v2729_v24  ;;  %2811 = vmatprep.mubr.f32.mxu0 %v4420_v27 }
 0x218   :  { %3567 = vmatpush1.msk.msra.mxu1 %vm114_vm1, %v2728_v15  ;;  %2882 = vmatprep.mubr.f32.mxu1 %v4420_v27  ;;  %v2903_v54 = vsel %vm1235_vm7, %v2894_v52, %v2896_v25 }
 0x219   :  { %v2898_v19 = vpop.permute.xlu0 %2897  ;;  %3565 = vmatmul.mubr.msk.f32.vlgmr.msra.gmra.mxu0 %vm110_vm3, %v3562_v58  ;;  %v2905_v17 = vmul.f32 %v2903_v54, %v4423_v18 }
 0x21a   :  { %v2902_v21 = vsel %vm1235_vm7, %v2896_v25, %v2898_v19  ;;  %3568 = vmatmul.mubr.msk.f32.vlgmr.msra.gmra.mxu1 %vm110_vm3, %v3562_v58  ;;  %2990 = vmatprep.mubr.f32.mxu0 %v4420_v27 }
 0x21b   :  { %v2906_v26 = vmul.f32 %v2902_v21, %v4422_v23  ;;  %v2900_v16 = vpop.permute.xlu1 %2899  ;;  %3061 = vmatprep.mubr.f32.mxu1 %v4420_v27 }
 0x21c   :  { %v2901_v28 = vsel %vm1235_vm7, %v2898_v19, %v2900_v16  ;;  %v2904_v39 = vsel %vm1235_vm7, %v2900_v16, %v2894_v52 }
 0x21d   :  { %v2907_v2 = vmul.f32 %v2901_v28, %v4424_v22  ;;  %v2908_v40 = vmul.f32 %v2904_v39, %v4425_v3  ;;  %v3073_v41 = vpop.permute.xlu0 %3072  ;;  %3570 = vmatprep.subr.msk.mxu0 %vm114_vm1, %v2906_v26 }
 0x21e   :  { %3571 = vmatpush1.msk.msra.mxu0 %vm114_vm1, %v2905_v17 }
 0x21f   :  { %3572 = vmatmul.mubr.msk.f32.vlgmr.msra.gmra.mxu0 %vm110_vm3, %v3569_v4  ;;  %v3075_v43 = vpop.permute.xlu1 %3074  ;;  %3573 = vmatprep.subr.msk.mxu1 %vm114_vm1, %v2908_v40 }
 0x220   :  { %3574 = vmatpush1.msk.msra.mxu1 %vm114_vm1, %v2907_v2  ;;  %3169 = vmatprep.mubr.f32.mxu0 %v4420_v27  ;;  %v3082_v1 = vsel %vm1438_vm8, %v3073_v41, %v3075_v43 }
 0x221   :  { %v3077_v35 = vpop.permute.xlu0 %3076  ;;  %3575 = vmatmul.mubr.msk.f32.vlgmr.msra.gmra.mxu1 %vm110_vm3, %v3569_v4  ;;  %v3084_v48 = vmul.f32 %v3082_v1, %v4427_v42 }
 0x222   :  { %v3081_v38 = vsel %vm1438_vm8, %v3075_v43, %v3077_v35  ;;  %3240 = vmatprep.mubr.f32.mxu1 %v4420_v27 }
 0x223   :  { %v3085_v61 = vmul.f32 %v3081_v38, %v4426_v37  ;;  %v3079_v6 = vpop.permute.xlu1 %3078 }
 0x224   :  { %v3080_v0 = vsel %vm1438_vm8, %v3077_v35, %v3079_v6  ;;  %v3083_v31 = vsel %vm1438_vm8, %v3079_v6, %v3073_v41 }
 0x225   :  { %v3086_v34 = vmul.f32 %v3080_v0, %v4428_v47  ;;  %v3087_v53 = vmul.f32 %v3083_v31, %v4429_v33  ;;  %v3252_v56 = vpop.permute.xlu0 %3251  ;;  %3577 = vmatprep.subr.msk.mxu0 %vm114_vm1, %v3085_v61 }
 0x226   :  { %3578 = vmatpush1.msk.msra.mxu0 %vm114_vm1, %v3084_v48 }
 0x227   :  { %3579 = vmatmul.mubr.msk.f32.vlgmr.msra.gmra.mxu0 %vm110_vm3, %v3576_v46  ;;  %v3254_v55 = vpop.permute.xlu1 %3253  ;;  %3580 = vmatprep.subr.msk.mxu1 %vm114_vm1, %v3087_v53 }
 0x228   :  { %3581 = vmatpush1.msk.msra.mxu1 %vm114_vm1, %v3086_v34  ;;  %3348 = vmatprep.mubr.f32.mxu0 %v4420_v27  ;;  %v3261_v44 = vsel %vm1641_vm9, %v3252_v56, %v3254_v55 }
 0x229   :  { %v3256_v10 = vpop.permute.xlu0 %3255  ;;  %3582 = vmatmul.mubr.msk.f32.vlgmr.msra.gmra.mxu1 %vm110_vm3, %v3576_v46  ;;  %v3263_v49 = vmul.f32 %v3261_v44, %v4431_v8 }
 0x22a   :  { %v3260_v45 = vsel %vm1641_vm9, %v3254_v55, %v3256_v10  ;;  %3419 = vmatprep.mubr.f32.mxu1 %v4420_v27 }
 0x22b   :  { %v3264_v11 = vmul.f32 %v3260_v45, %v4430_v14  ;;  %v3258_v9 = vpop.permute.xlu1 %3257 }
 0x22c   :  { %v3259_v50 = vsel %vm1641_vm9, %v3256_v10, %v3258_v9  ;;  %v3262_v57 = vsel %vm1641_vm9, %v3258_v9, %v3252_v56 }
 0x22d   :  { %v3265_v60 = vmul.f32 %v3259_v50, %v4432_v30  ;;  %v3266_v12 = vmul.f32 %v3262_v57, %v4433_v32  ;;  %3584 = vmatprep.subr.msk.mxu0 %vm114_vm1, %v3264_v11 }
 0x22e   :  { %3585 = vmatpush1.msk.msra.mxu0 %vm114_vm1, %v3263_v49 }
 0x22f   :  { %3586 = vmatmul.mubr.msk.f32.vlgmr.msra.gmra.mxu0 %vm110_vm3, %v3583_v29  ;;  %3587 = vmatprep.subr.msk.mxu1 %vm114_vm1, %v3266_v12 }
 0x230   :  { %3588 = vmatpush1.msk.msra.mxu1 %vm114_vm1, %v3265_v60 }
 0x231   :  { %3589 = vmatmul.mubr.msk.f32.vlgmr.msra.gmra.mxu1 %vm110_vm3, %v3583_v29 }
 0x2b8   :  { %v1956_v7 = vpop.f32.mrf.mxu0 }
 0x2b9   :  { %v2027_v27 = vpop.f32.mrf.mxu1 }
 0x2ba   :  { %v1958_v5 = vpop.f32.mrf.mxu0 }
 0x2bb   :  { %v2029_v59 = vpop.f32.mrf.mxu1 }
 0x2c0   :  { %v2113_v36 = vpop.f32.mrf.mxu0 }
 0x2c1   :  { %v2184_v62 = vpop.f32.mrf.mxu1  ;;  %v2114_v26 = vadd.f32 %v2113_v36, %v1956_v7 }
 0x2c2   :  { %v2115_v63 = vpop.f32.mrf.mxu0  ;;  %v2185_v18 = vadd.f32 %v2184_v62, %v2027_v27  ;;  %v4434_v62 = vld [vmem:[#allocation6_spill] sm:$0xff] }
 0x2c3   :  { %v2186_v51 = vpop.f32.mrf.mxu1  ;;  %v2116_v17 = vadd.f32 %v2115_v63, %v1958_v5 }
 0x2c4   :  { %v2187_v22 = vadd.f32 %v2186_v51, %v2029_v59  ;;  %v3602_v59 = vld [vmem:[%s4383_s0] sm:$0xff] }
 0x2c8   :  { %v2288_v13 = vpop.f32.mrf.mxu0 }
 0x2c9   :  { %v2359_v15 = vpop.f32.mrf.mxu1  ;;  %v2364_v39 = vadd.f32 %v2288_v13, %v2114_v26  ;;  %v3603_v13 = vld [vmem:[%s4383_s0 + $0x8] sm:$0xff] }
 0x2ca   :  { %v2290_v20 = vpop.f32.mrf.mxu0  ;;  %v2366_v2 = vadd.f32 %v2359_v15, %v2185_v18 }
 0x2cb   :  { %v2361_v24 = vpop.f32.mrf.mxu1  ;;  %v2365_v3 = vadd.f32 %v2290_v20, %v2116_v17  ;;  %v4435_v20 = vld [vmem:[#allocation5_spill] sm:$0xff] }
 0x2cc   :  { %v2367_v35 = vadd.f32 %v2361_v24, %v2187_v22 }
 0x2d1   :  { %v2467_v52 = vpop.f32.mrf.mxu0 }
 0x2d2   :  { %v2538_v58 = vpop.f32.mrf.mxu1  ;;  %v2543_v41 = vadd.f32 %v2467_v52, %v2364_v39 }
 0x2d3   :  { %v2469_v25 = vpop.f32.mrf.mxu0  ;;  %v2545_v38 = vadd.f32 %v2538_v58, %v2366_v2 }
 0x2d4   :  { %v2540_v54 = vpop.f32.mrf.mxu1  ;;  %v2544_v37 = vadd.f32 %v2469_v25, %v2365_v3 }
 0x2d5   :  { %v2634_v19 = vpop.f32.mrf.mxu0  ;;  %v2546_v48 = vadd.f32 %v2540_v54, %v2367_v35 }
 0x2d6   :  { %v2705_v21 = vpop.f32.mrf.mxu1  ;;  %v2710_v6 = vadd.f32 %v2634_v19, %v2543_v41 }
 0x2d7   :  { %v2636_v23 = vpop.f32.mrf.mxu0  ;;  %v2712_v0 = vadd.f32 %v2705_v21, %v2545_v38 }
 0x2d8   :  { %v2707_v16 = vpop.f32.mrf.mxu1  ;;  %v2711_v31 = vadd.f32 %v2636_v23, %v2544_v37 }
 0x2d9   :  { %v2813_v28 = vpop.f32.mrf.mxu0  ;;  %v2713_v53 = vadd.f32 %v2707_v16, %v2546_v48 }
 0x2da   :  { %v2884_v4 = vpop.f32.mrf.mxu1  ;;  %v2889_v34 = vadd.f32 %v2813_v28, %v2710_v6 }
 0x2db   :  { %v2815_v40 = vpop.f32.mrf.mxu0  ;;  %v2891_v56 = vadd.f32 %v2884_v4, %v2712_v0 }
 0x2dc   :  { %v2886_v43 = vpop.f32.mrf.mxu1  ;;  %v2890_v55 = vadd.f32 %v2815_v40, %v2711_v31 }
 0x2dd   :  { %v2892_v45 = vadd.f32 %v2886_v43, %v2713_v53 }
 0x2df   :  { %v2992_v1 = vpop.f32.mrf.mxu0 }
 0x2e0   :  { %v3068_v44 = vadd.f32 %v2992_v1, %v2889_v34 }
 0x2e1   :  { %v3063_v61 = vpop.f32.mrf.mxu1  ;;  %v2994_v42 = vpop.f32.mrf.mxu0 }
 0x2e2   :  { %v3069_v14 = vadd.f32 %v2994_v42, %v2890_v55  ;;  %v3070_v11 = vadd.f32 %v3063_v61, %v2891_v56 }
 0x2e3   :  { %v3065_v46 = vpop.f32.mrf.mxu1 }
 0x2e4   :  { %v3071_v50 = vadd.f32 %v3065_v46, %v2892_v45 }
 0x2e7   :  { %v3171_v47 = vpop.f32.mrf.mxu0 }
 0x2e8   :  { %v3247_v9 = vadd.f32 %v3171_v47, %v3068_v44 }
 0x2e9   :  { %v3242_v33 = vpop.f32.mrf.mxu1  ;;  %v3173_v10 = vpop.f32.mrf.mxu0 }
 0x2ea   :  { %v3248_v57 = vadd.f32 %v3173_v10, %v3069_v14  ;;  %v3249_v29 = vadd.f32 %v3242_v33, %v3070_v11 }
 0x2eb   :  { %v3244_v8 = vpop.f32.mrf.mxu1 }
 0x2ec   :  { %v3250_v12 = vadd.f32 %v3244_v8, %v3071_v50 }
 0x2ef   :  { %v3350_v49 = vpop.f32.mrf.mxu0 }
 0x2f0   :  { %v3426_v30 = vadd.f32 %v3350_v49, %v3247_v9 }
 0x2f1   :  { %v3352_v60 = vpop.f32.mrf.mxu0  ;;  %v3421_v32 = vpop.f32.mrf.mxu1 }
 0x2f2   :  { %v3427_v7 = vadd.f32 %v3352_v60, %v3248_v57  ;;  %v3428_v27 = vadd.f32 %v3421_v32, %v3249_v29  ;;  %v3430_v36 = vadd.f32 %v3602_v59, %v3426_v30 }
 0x2f3   :  { %v3423_v5 = vpop.f32.mrf.mxu1 }
 0x2f4   :  { %v3431_v63 = vadd.f32 %v3427_v7, %v4434_v62  ;;  %v3429_v51 = vadd.f32 %v3423_v5, %v3250_v12  ;;  %v3432_v15 = vadd.f32 %v3603_v13, %v3428_v27 }
 0x2f6   :  { %v3433_v24 = vadd.f32 %v3429_v51, %v4435_v20  ;;  %v3438_v52 = vcombine.low %v3430_v36, %v3431_v63 }
 0x2f8   :  { %v3439_v58 = vcombine.low %v3432_v15, %v3433_v24  ;;  %3442 = vst [vmem:[#allocation2] sm:$0xff] %v3438_v52 }
 0x2fa   :  { %3443 = vst [vmem:[#allocation2 + $0x8] sm:$0xff] %v3439_v58 }
 0x2fb   :  { %3615 = shalt.err (!%p3612_p4)
}
 0x2fc   :  { %3453 = dma.vmem_to_hbm [thread:$0]  %s3451_s11, 256, %s4387_s4, [#allocation3]  }
 0x2fd   :  { %3624 = dma.done.wait [#allocation3], 256  }
 0x2fe   :  { %3625 = vsyncadd [#allocation3], 4294967040 }
 0x2ff   :  { %3457 = vsyncpa [#allocation3], 1 }

</bundles_post_ra>
